<compile_context>
chip_gen: v5e
topology: v5e:2x2
jax: 0.10.0
libtpu: 0.0.40
codegen_flags: <defaults>
</compile_context>

<pallas_src>
import jax
import jax.numpy as jnp
from jax.experimental import pallas as pl
from jax.experimental.pallas import tpu as pltpu


def _conv_bn_add_relu_kernel(x_ref, w_ref, shift_ref, res_ref, o_ref):
    # x_ref:     (1, Cin, TP)   subsampled input pixels, channel-major (NCHW-native), bf16
    # w_ref:     (Cout, Cin)    1x1 conv weight with BN scale folded in, bf16
    # shift_ref: (Cout, 1)      beta - running_mean * scale, f32
    # res_ref:   (1, Cout, TP)  residual to add, bf16
    # o_ref:     (1, Cout, TP)  f32
    acc = jnp.dot(w_ref[...], x_ref[0], preferred_element_type=jnp.float32)  # (Cout, TP)
    y = acc + shift_ref[...] + res_ref[0].astype(jnp.float32)
    o_ref[0] = jnp.maximum(y, 0.0).astype(o_ref.dtype)


def _tensorcores_per_chip():
    # Trace-time heuristic: only v7x (2 TCs/chip) benefits from splitting the tiny
    # pixel axis; all other supported gens are single-TC.
    try:
        kind = jax.devices()[0].device_kind.lower()
    except Exception:
        return 1
    return 2 if "v7" in kind else 1


def conv_bn_add_relu(x_nchw, res_nchw, weight, gamma, beta, run_mean, run_var,
                     eps=1e-5, compute_dtype=jnp.bfloat16):
    """x_nchw: (N, Cin, H, W); res_nchw: (N, Cout, H//2, W//2); weight: (Cout, Cin, 1, 1)."""
    N, Cin, H, W = x_nchw.shape
    Cout = weight.shape[0]
    out_dtype = x_nchw.dtype

    # 1x1 conv, stride 2, no padding == subsample pixels, then per-pixel channel matmul.
    # Under jit this slice + the reshapes + BN fold are one fusion next to the kernel.
    xs = x_nchw[:, :, ::2, ::2]                    # (N, Cin, Ho, Wo) -- slice only, no transpose
    Ho, Wo = xs.shape[2], xs.shape[3]
    P = Ho * Wo
    x3d = xs.reshape(N, Cin, P).astype(compute_dtype)          # free reshape + bf16 cast
    r3d = res_nchw.reshape(N, Cout, P).astype(compute_dtype)   # free reshape + bf16 cast

    # Fold BN (inference) scale into the conv weight; keep only the per-channel shift.
    inv_std = jax.lax.rsqrt(run_var + eps)
    scale = gamma * inv_std                                               # (Cout,)
    w2d = (weight.reshape(Cout, Cin) * scale[:, None]).astype(compute_dtype)  # (Cout, Cin)
    shift = (beta - run_mean * scale).reshape(Cout, 1).astype(jnp.float32)    # (Cout, 1)

    # Pixel-axis tiling:
    #  * single TC (v5e/v6e): one full-P block -> no per-step overhead, no masked tail.
    #  * dual TC (v7x): >=2 lane-dense (multiple-of-128) blocks on a "parallel" axis.
    if _tensorcores_per_chip() >= 2 and P > 256:
        tile_p = min(P, max(128, ((pl.cdiv(P, 2) + 127) // 128) * 128))
    else:
        tile_p = P
    grid = (N, pl.cdiv(P, tile_p))

    itm = lambda a: a.size * jnp.dtype(a.dtype).itemsize
    bytes_accessed = (itm(x3d) + itm(r3d) + itm(w2d) + itm(shift)
                      + N * Cout * P * jnp.dtype(out_dtype).itemsize)
    cost = pl.CostEstimate(flops=2 * N * P * Cout * Cin,
                           transcendentals=0,
                           bytes_accessed=int(bytes_accessed))

    out3d = pl.pallas_call(
        _conv_bn_add_relu_kernel,
        out_shape=jax.ShapeDtypeStruct((N, Cout, P), out_dtype),
        grid_spec=pltpu.PrefetchScalarGridSpec(
            num_scalar_prefetch=0,
            grid=grid,
            in_specs=[
                pl.BlockSpec((1, Cin, tile_p), lambda n, j: (n, 0, j)),
                pl.BlockSpec((Cout, Cin), lambda n, j: (0, 0)),
                pl.BlockSpec((Cout, 1), lambda n, j: (0, 0)),
                pl.BlockSpec((1, Cout, tile_p), lambda n, j: (n, 0, j)),
            ],
            out_specs=pl.BlockSpec((1, Cout, tile_p), lambda n, j: (n, 0, j)),
        ),
        compiler_params=pltpu.CompilerParams(
            dimension_semantics=("parallel", "parallel")),
        cost_estimate=cost,
    )(x3d, w2d, shift, r3d)

    # Free reshape back to NCHW (no transpose needed).
    return out3d.reshape(N, Cout, Ho, Wo)


if __name__ == "__main__":
    key = jax.random.PRNGKey(0)
    k1, k2, k3, k4, k5, k6, k7 = jax.random.split(key, 7)

    # Shapes from the module spec: Cin=64 -> Cout=128, stride-2 over 56x56 -> 28x28.
    N, Cin, H, W = 1, 64, 56, 56
    Cout, Ho, Wo = 128, H // 2, W // 2

    x15 = jax.random.normal(k1, (N, Cin, H, W), dtype=jnp.float32)
    x25 = jax.random.normal(k2, (N, Cout, Ho, Wo), dtype=jnp.float32)

    # Deterministic parameter init.
    weight = 0.05 * jax.random.normal(k3, (Cout, Cin, 1, 1), dtype=jnp.float32)
    gamma = 1.0 + 0.1 * jax.random.normal(k4, (Cout,), dtype=jnp.float32)
    beta = 0.1 * jax.random.normal(k5, (Cout,), dtype=jnp.float32)
    run_mean = 0.1 * jax.random.normal(k6, (Cout,), dtype=jnp.float32)
    run_var = jnp.abs(1.0 + 0.1 * jax.random.normal(k7, (Cout,), dtype=jnp.float32))

    fused = jax.jit(conv_bn_add_relu)
    out = fused(x15, x25, weight, gamma, beta, run_mean, run_var)
    out = jax.block_until_ready(out)

    # Reference check in plain JAX f32 (same eval-mode BN semantics).
    conv = jax.lax.conv_general_dilated(
        x15, weight, window_strides=(2, 2), padding="VALID",
        dimension_numbers=("NCHW", "OIHW", "NCHW"))
    bn = (conv - run_mean[None, :, None, None]) / jnp.sqrt(
        run_var[None, :, None, None] + 1e-5) * gamma[None, :, None, None] \
        + beta[None, :, None, None]
    ref = jnp.maximum(bn + x25, 0.0)
    assert out.shape == (N, Cout, Ho, Wo)
    # bf16 inputs (f32 accumulate) -> ~1e-2 level error vs the f32 reference.
    assert jnp.allclose(out, ref, atol=3e-2, rtol=3e-2)

    print("KERNEL_OK")
</pallas_src>

<mosaic_0001>
module attributes {stable_mosaic.version = 11 : i64} {
  func.func @_conv_bn_add_relu_kernel(%arg0: i32, %arg1: i32, %arg2: memref<1x64x784xbf16, #tpu.memory_space<vmem>>, %arg3: memref<128x64xbf16, #tpu.memory_space<vmem>>, %arg4: memref<128x1xf32, #tpu.memory_space<vmem>>, %arg5: memref<1x128x784xbf16, #tpu.memory_space<vmem>>, %arg6: memref<1x128x784xf32, #tpu.memory_space<vmem>>) attributes {dimension_semantics = [#tpu.dimension_semantics<parallel>, #tpu.dimension_semantics<parallel>], iteration_bounds = array<i64: 1, 1>, scalar_prefetch = 0 : i64, scratch_operands = 0 : i64, tpu.core_type = #tpu.core_type<tc>, window_params = [{transform_indices = @transform_0, window_bounds = array<i64: 1, 64, 784>}, {pipeline_mode = #tpu.pipeline_mode<synchronous>, transform_indices = @transform_1, window_bounds = array<i64: 128, 64>}, {pipeline_mode = #tpu.pipeline_mode<synchronous>, transform_indices = @transform_2, window_bounds = array<i64: 128, 1>}, {transform_indices = @transform_3, window_bounds = array<i64: 1, 128, 784>}, {transform_indices = @transform_4, window_bounds = array<i64: 1, 128, 784>}]} {
    %c0 = arith.constant 0 : index
    %c0_0 = arith.constant 0 : index
    %0 = vector.load %arg3[%c0, %c0_0] : memref<128x64xbf16, #tpu.memory_space<vmem>>, vector<128x64xbf16>
    %c0_1 = arith.constant 0 : index
    %c0_2 = arith.constant 0 : index
    %c0_3 = arith.constant 0 : index
    %1 = vector.load %arg2[%c0_1, %c0_2, %c0_3] : memref<1x64x784xbf16, #tpu.memory_space<vmem>>, vector<1x64x784xbf16>
    %2 = vector.shape_cast %1 : vector<1x64x784xbf16> to vector<64x784xbf16>
    %cst = arith.constant dense<0.000000e+00> : vector<128x784xf32>
    %3 = tpu.matmul %0, %2, %cst {dimension_numbers = #tpu.dot_dimension_numbers<[1], [0], [0], [1], [0, 0, 1, 1], [], []>} : vector<128x64xbf16>, vector<64x784xbf16>, vector<128x784xf32> -> vector<128x784xf32>
    %c0_4 = arith.constant 0 : index
    %c0_5 = arith.constant 0 : index
    %4 = vector.load %arg4[%c0_4, %c0_5] : memref<128x1xf32, #tpu.memory_space<vmem>>, vector<128x1xf32>
    %5 = vector.broadcast %4 : vector<128x1xf32> to vector<128x784xf32>
    %6 = arith.addf %3, %5 : vector<128x784xf32>
    %c0_6 = arith.constant 0 : index
    %c0_7 = arith.constant 0 : index
    %c0_8 = arith.constant 0 : index
    %7 = vector.load %arg5[%c0_6, %c0_7, %c0_8] : memref<1x128x784xbf16, #tpu.memory_space<vmem>>, vector<1x128x784xbf16>
    %8 = vector.shape_cast %7 : vector<1x128x784xbf16> to vector<128x784xbf16>
    %9 = arith.extf %8 : vector<128x784xbf16> to vector<128x784xf32>
    %10 = arith.addf %6, %9 : vector<128x784xf32>
    %cst_9 = arith.constant 0.000000e+00 : f32
    %11 = vector.broadcast %cst_9 : f32 to vector<128x784xf32>
    %12 = arith.maximumf %10, %11 : vector<128x784xf32>
    %c0_10 = arith.constant 0 : index
    %c0_11 = arith.constant 0 : index
    %c0_12 = arith.constant 0 : index
    %13 = vector.load %arg6[%c0_10, %c0_11, %c0_12] : memref<1x128x784xf32, #tpu.memory_space<vmem>>, vector<1x128x784xf32>
    %14 = vector.shape_cast %13 : vector<1x128x784xf32> to vector<128x784xf32>
    %15 = vector.shape_cast %12 : vector<128x784xf32> to vector<1x128x784xf32>
    tpu.vector_store %arg6[%c0_10, %c0_11, %c0_12], %15 {strides = array<i32>} : memref<1x128x784xf32, #tpu.memory_space<vmem>>, vector<1x128x784xf32>,
    return
  }
  func.func @transform_0(%arg0: i32, %arg1: i32) -> (i32, i32, i32) {
    %c0_i32 = arith.constant 0 : i32
    %c0_i32_0 = arith.constant 0 : i32
    return %arg0, %c0_i32, %arg1 : i32, i32, i32
  }
  func.func @transform_1(%arg0: i32, %arg1: i32) -> (i32, i32) {
    %c0_i32 = arith.constant 0 : i32
    %c0_i32_0 = arith.constant 0 : i32
    %c0_i32_1 = arith.constant 0 : i32
    return %c0_i32, %c0_i32_0 : i32, i32
  }
  func.func @transform_2(%arg0: i32, %arg1: i32) -> (i32, i32) {
    %c0_i32 = arith.constant 0 : i32
    %c0_i32_0 = arith.constant 0 : i32
    %c0_i32_1 = arith.constant 0 : i32
    return %c0_i32, %c0_i32_0 : i32, i32
  }
  func.func @transform_3(%arg0: i32, %arg1: i32) -> (i32, i32, i32) {
    %c0_i32 = arith.constant 0 : i32
    %c0_i32_0 = arith.constant 0 : i32
    return %arg0, %c0_i32, %arg1 : i32, i32, i32
  }
  func.func @transform_4(%arg0: i32, %arg1: i32) -> (i32, i32, i32) {
    %c0_i32 = arith.constant 0 : i32
    %c0_i32_0 = arith.constant 0 : i32
    return %arg0, %c0_i32, %arg1 : i32, i32, i32
  }
}

</mosaic_0001>

<bundles_post_ra>
// kernel: conv_bn_add_relu.1
= control target key start
LH: loop header
LB: loop body
LE: loop exit
PB: predicated region body
PF: predicated region fallthrough
CT: control target
= control target key end

     0   :  { %v1483_v0 = vmov 0   ;;  %vm346_vm0 = vcmask 523264   ;;  %vm1120_vm1 = vcmask 130048   ;;  %s2669_s2 = inlined_call_operand.vmem [shape: f32[128,1], index: 2, kind: input, shape index: {}]   ;;  %s2670_s0 = inlined_call_operand.vmem [shape: bf16[1,64,784], index: 0, kind: input, shape index: {}]   ;;  %s2671_s1 = inlined_call_operand.vmem [shape: bf16[128,64], index: 1, kind: input, shape index: {}]   ;;  %s2672_s3 = inlined_call_operand.vmem [shape: bf16[1,128,784], index: 3, kind: input, shape index: {}]   ;;  %s2673_s4 = inlined_call_operand.vmem [shape: f32[1,128,784], index: 4, kind: output, shape index: {}]  }
   0x1   :  { %1480 = vset.pattern.permute.xlu0 %v1483_v0  ;;  %v66_v1 = vld [vmem:[%s2669_s2] sm:$0xff]  ;;  %v1349_v2 = vld [vmem:[%s2670_s0 + $0xa8] sm:$0xf]  ;;  %1481 = vset.pattern.permute.xlu1 %v1483_v0  ;;  %v1460_v5 = vld [vmem:[%s2670_s0 + $0xac] sm:$0xf] }
   0x2   :  { %v1463_v3 = vld [vmem:[%s2670_s0 + $0xc0] sm:$0xf0]  ;;  %84 = vperm.xlu0 %1480, %v66_v1   ;;  %v1351_v6 = vld [vmem:[%s2670_s0 + $0xc4] sm:$0xf0]  ;;  %v1357_v7 = vld [vmem:[%s2670_s0 + $0xb0] sm:$0xf]  ;;  %1482 = vset.pattern.permute.xlu2 %v1483_v0 }
   0x3   :  { %v1350_v4 = vor.u32 %v1463_v3, %v1349_v2  ;;  %v1354_v8 = vor.u32 %v1460_v5, %v1351_v6  ;;  %v1464_v9 = vld [vmem:[%s2670_s0 + $0xc8] sm:$0xf0]  ;;  %v1321_v10 = vld [vmem:[%s2670_s0 + $0x70] sm:$0xf]  ;;  %v1453_v14 = vld [vmem:[%s2670_s0 + $0x74] sm:$0xf] }
   0x4   :  { %v1456_v11 = vld [vmem:[%s2670_s0 + $0x88] sm:$0xf0]  ;;  %v1536_v12 = vor.u32 %v1464_v9, %v1357_v7  ;;  %v1323_v15 = vld [vmem:[%s2670_s0 + $0x8c] sm:$0xf0]  ;;  %v1329_v16 = vld [vmem:[%s2670_s0 + $0x78] sm:$0xf] }
   0x5   :  { %375 = vmatpush.bf16.msra.mxu0 %v1350_v4  ;;  %1467 = vmatpush.bf16.msra.mxu3 %v1350_v4  ;;  %v1322_v13 = vor.u32 %v1456_v11, %v1321_v10  ;;  %v1547_v17 = vor.u32 %v1453_v14, %v1323_v15  ;;  %v1457_v18 = vld [vmem:[%s2670_s0 + $0x90] sm:$0xf0]  ;;  %v67_v20 = vld [vmem:[%s2669_s2 + $0x8] sm:$0xff]  ;;  %v1293_v22 = vld [vmem:[%s2670_s0 + $0x38] sm:$0xf] }
   0x6   :  { %424 = vmatpush.bf16.msra.mxu1 %v1354_v8  ;;  %v68_v19 = vld [vmem:[%s2669_s2 + $0x10] sm:$0xff]  ;;  %473 = vmatpush.bf16.msra.mxu2 %v1536_v12  ;;  %v1559_v21 = vor.u32 %v1457_v18, %v1329_v16  ;;  %v1446_v24 = vld [vmem:[%s2670_s0 + $0x3c] sm:$0xf]  ;;  %v1295_v25 = vld [vmem:[%s2670_s0 + $0x54] sm:$0xf0] }
   0x7   :  { %94 = vperm.xlu1 %1481, %v68_v19   ;;  %v1449_v23 = vld [vmem:[%s2670_s0 + $0x50] sm:$0xf0]  ;;  %v1301_v26 = vld [vmem:[%s2670_s0 + $0x40] sm:$0xf]  ;;  %v1450_v27 = vld [vmem:[%s2670_s0 + $0x58] sm:$0xf0]  ;;  %v1580_v29 = vor.u32 %v1446_v24, %v1295_v25 }
   0x8   :  { %v1294_v28 = vor.u32 %v1449_v23, %v1293_v22  ;;  %v1265_v30 = vld [vmem:[%s2670_s0] sm:$0xf]  ;;  %v1442_v31 = vld [vmem:[%s2670_s0 + $0x18] sm:$0xf0]  ;;  %v1589_v32 = vor.u32 %v1450_v27, %v1301_v26  ;;  %v1439_v33 = vld [vmem:[%s2670_s0 + $0x4] sm:$0xf] }
   0x9   :  { %376 = vmatpush.bf16.msra.mxu0 %v1322_v13  ;;  %1468 = vmatpush.bf16.msra.mxu3 %v1322_v13  ;;  %v1267_v34 = vld [vmem:[%s2670_s0 + $0x1c] sm:$0xf0]  ;;  %v1273_v35 = vld [vmem:[%s2670_s0 + $0x8] sm:$0xf]  ;;  %v1443_v36 = vld [vmem:[%s2670_s0 + $0x20] sm:$0xf0]  ;;  %v1266_v38 = vor.u32 %v1442_v31, %v1265_v30 }
   0xa   :  { %425 = vmatpush.bf16.msra.mxu1 %v1547_v17  ;;  %474 = vmatpush.bf16.msra.mxu2 %v1559_v21  ;;  %v69_v37 = vld [vmem:[%s2669_s2 + $0x18] sm:$0xff]  ;;  %v1270_v39 = vor.u32 %v1439_v33, %v1267_v34  ;;  %v1610_v40 = vld [vmem:[%s2671_s1] sm:$0xff]  ;;  %v1619_v43 = vor.u32 %v1443_v36, %v1273_v35  ;;  %v1624_v44 = vld [vmem:[%s2671_s1 + $0x30] sm:$0xff] }
   0xb   :  { %89 = vperm.xlu0 %1480, %v67_v20   ;;  %v1373_v41 = vld [vmem:[%s2670_s0 + $0xc0] sm:$0xf]  ;;  %v1466_v42 = vld [vmem:[%s2670_s0 + $0xd8] sm:$0xf0]  ;;  %v1365_v45 = vld [vmem:[%s2670_s0 + $0xb8] sm:$0xf] }
   0xc   :  { %v1465_v46 = vld [vmem:[%s2670_s0 + $0xd0] sm:$0xf0]  ;;  %v1462_v48 = vld [vmem:[%s2670_s0 + $0xbc] sm:$0xf]  ;;  %v1367_v49 = vld [vmem:[%s2670_s0 + $0xd4] sm:$0xf0]  ;;  %v1374_v50 = vor.u32 %v1466_v42, %v1373_v41 }
   0xd   :  { %377 = vmatpush.bf16.msra.mxu0 %v1294_v28  ;;  %1469 = vmatpush.bf16.msra.mxu3 %v1294_v28  ;;  %v72_v47 = vld [vmem:[%s2669_s2 + $0x30] sm:$0xff]  ;;  %v1366_v51 = vor.u32 %v1465_v46, %v1365_v45  ;;  %v1345_v52 = vld [vmem:[%s2670_s0 + $0x88] sm:$0xf]  ;;  %v1459_v53 = vld [vmem:[%s2670_s0 + $0xa0] sm:$0xf0]  ;;  %v1370_v54 = vor.u32 %v1462_v48, %v1367_v49 }
   0xe   :  { %426 = vmatpush.bf16.msra.mxu1 %v1580_v29  ;;  %475 = vmatpush.bf16.msra.mxu2 %v1589_v32  ;;  %v1337_v55 = vld [vmem:[%s2670_s0 + $0x80] sm:$0xf]  ;;  %v1458_v56 = vld [vmem:[%s2670_s0 + $0x98] sm:$0xf0]  ;;  %v1346_v58 = vor.u32 %v1459_v53, %v1345_v52  ;;  %v1455_v60 = vld [vmem:[%s2670_s0 + $0x84] sm:$0xf] }
   0xf   :  { %99 = vperm.xlu1 %1481, %v69_v37   ;;  %v73_v57 = vld [vmem:[%s2669_s2 + $0x38] sm:$0xff]  ;;  %v70_v59 = vld [vmem:[%s2669_s2 + $0x20] sm:$0xff]  ;;  %v1338_v62 = vor.u32 %v1458_v56, %v1337_v55  ;;  %v75_v63 = vld [vmem:[%s2669_s2 + $0x48] sm:$0xff] }
  0x10   :  { %v1339_v61 = vld [vmem:[%s2670_s0 + $0x9c] sm:$0xf0]  ;;  %104 = vperm.xlu2 %1482, %v70_v59   ;;  %v76_v1 = vld [vmem:[%s2669_s2 + $0x50] sm:$0xff]  ;;  %v71_v2 = vld [vmem:[%s2669_s2 + $0x28] sm:$0xff] }
  0x11   :  { %378 = vmatpush.bf16.msra.mxu0 %v1266_v38  ;;  %1470 = vmatpush.bf16.msra.mxu3 %v1266_v38  ;;  %v1342_v0 = vor.u32 %v1455_v60, %v1339_v61  ;;  %v1688_v3 = vld [vmem:[%s2671_s1 + $0x8] sm:$0xff]  ;;  %v1693_v4 = vld [vmem:[%s2671_s1 + $0x38] sm:$0xff]  ;;  %v78_v5 = vld [vmem:[%s2669_s2 + $0x60] sm:$0xff] }
  0x12   :  { %427 = vmatpush.bf16.msra.mxu1 %v1270_v39  ;;  %476 = vmatpush.bf16.msra.mxu2 %v1619_v43  ;;  %v79_v6 = vld [vmem:[%s2669_s2 + $0x68] sm:$0xff]  ;;  %v74_v7 = vld [vmem:[%s2669_s2 + $0x40] sm:$0xff]  ;;  %v81_v14 = vld [vmem:[%s2669_s2 + $0x78] sm:$0xff] }
  0x13   :  { %114 = vperm.xlu0 %1480, %v72_v47   ;;  %v1452_v9 = vld [vmem:[%s2670_s0 + $0x68] sm:$0xf0]  ;;  %v1309_v11 = vld [vmem:[%s2670_s0 + $0x48] sm:$0xf]  ;;  %v77_v18 = vld [vmem:[%s2669_s2 + $0x58] sm:$0xff] }
  0x14   :  { %1375 = vmatmul.msk.bf16.vlgmr.msra.gmra.mxu0 %vm346_vm0, %v1610_v40  ;;  %1381 = vmatmul.msk.bf16.vlgmr.msra.gmra.mxu3 %vm346_vm0, %v1624_v44  ;;  %v1448_v13 = vld [vmem:[%s2670_s0 + $0x4c] sm:$0xf]  ;;  %v1311_v16 = vld [vmem:[%s2670_s0 + $0x64] sm:$0xf0]  ;;  %v1743_v19 = vld [vmem:[%s2671_s1 + $0x10] sm:$0xff] }
  0x15   :  { %1471 = vmatpush.bf16.msrb.mxu3 %v1354_v8  ;;  %1383 = vmatmul.msk.bf16.vlgmr.msra.gmra.mxu1 %vm346_vm0, %v1610_v40  ;;  %v1317_v8 = vld [vmem:[%s2670_s0 + $0x50] sm:$0xf]  ;;  %v1454_v23 = vld [vmem:[%s2670_s0 + $0x7c] sm:$0xf]  ;;  %v1331_v25 = vld [vmem:[%s2670_s0 + $0x94] sm:$0xf0] }
  0x16   :  { %669 = vmatpush.bf16.msrb.mxu2 %v1374_v50  ;;  %571 = vmatpush.bf16.msrb.mxu0 %v1366_v51  ;;  %v1318_v10 = vor.u32 %v1452_v9, %v1317_v8  ;;  %v80_v20 = vld [vmem:[%s2669_s2 + $0x70] sm:$0xff]  ;;  %v1289_v26 = vld [vmem:[%s2670_s0 + $0x18] sm:$0xf]  ;;  %v1444_v30 = vld [vmem:[%s2670_s0 + $0x28] sm:$0xf0] }
  0x17   :  { %1391 = vmatmul.msk.bf16.vlgmr.msra.gmra.mxu2 %vm346_vm0, %v1610_v40  ;;  %620 = vmatpush.bf16.msrb.mxu1 %v1370_v54  ;;  %v1359_v22 = vld [vmem:[%s2670_s0 + $0xcc] sm:$0xf0]  ;;  %v1445_v27 = vld [vmem:[%s2670_s0 + $0x30] sm:$0xf0]  ;;  %v1789_v36 = vld [vmem:[%s2671_s1 + $0x18] sm:$0xff] }
  0x18   :  { %119 = vperm.xlu1 %1481, %v73_v57   ;;  %109 = vperm.xlu2 %1482, %v71_v2   ;;  %v1290_v28 = vor.u32 %v1445_v27, %v1289_v26  ;;  %v1441_v31 = vld [vmem:[%s2670_s0 + $0x14] sm:$0xf]  ;;  %v1283_v34 = vld [vmem:[%s2670_s0 + $0x2c] sm:$0xf0]  ;;  %v1447_v37 = vld [vmem:[%s2670_s0 + $0x44] sm:$0xf] }
  0x19   :  { %1472 = vmatpush.bf16.msrb.mxu3 %v1547_v17  ;;  %v1314_v17 = vor.u32 %v1448_v13, %v1311_v16  ;;  %v1286_v35 = vor.u32 %v1441_v31, %v1283_v34  ;;  %v1303_v38 = vld [vmem:[%s2670_s0 + $0x5c] sm:$0xf0]  ;;  %v1275_v42 = vld [vmem:[%s2670_s0 + $0x24] sm:$0xf0] }
  0x1a   :  { %670 = vmatpush.bf16.msrb.mxu2 %v1346_v58  ;;  %572 = vmatpush.bf16.msrb.mxu0 %v1338_v62  ;;  %v1306_v41 = vor.u32 %v1447_v37, %v1303_v38  ;;  %v1814_v45 = vld [vmem:[%s2671_s1 + $0x20] sm:$0xff]  ;;  %v1827_v46 = vld [vmem:[%s2671_s1 + $0x28] sm:$0xff] }
  0x1b   :  { %129 = vperm.xlu0 %1480, %v75_v63   ;;  %621 = vmatpush.bf16.msrb.mxu1 %v1342_v0  ;;  %v714_v55 = vld [vmem:[%s2672_s3] sm:$0xff]  ;;  %v1883_v0 = vld [vmem:[%s2672_s3 + $0x150] sm:$0xff] }
  0x1c   :  { %v778_v56 = vunpack.c.l.bf16 %v714_v55  ;;  %v779_v58 = vunpack.c.h.bf16 %v714_v55  ;;  %v862_v8 = vunpack.c.l.bf16 %v1883_v0 }
  0x1d   :  { %1473 = vmatpush.bf16.msrb.mxu3 %v1580_v29  ;;  %v1281_v29 = vld [vmem:[%s2670_s0 + $0x10] sm:$0xf] }
  0x1e   :  { %671 = vmatpush.bf16.msrb.mxu2 %v1318_v10  ;;  %v1282_v33 = vor.u32 %v1444_v30, %v1281_v29  ;;  %v1927_v29 = vld [vmem:[%s2672_s3 + $0x24] sm:$0xff]  ;;  %v722_v30 = vld [vmem:[%s2672_s3 + $0x38] sm:$0xff] }
  0x1f   :  { %622 = vmatpush.bf16.msrb.mxu1 %v1314_v17  ;;  %v787_v38 = vunpack.c.l.bf16 %v1927_v29 }
  0x20   :  { %134 = vperm.xlu1 %1481, %v76_v1   ;;  %124 = vperm.xlu2 %1482, %v74_v7  }
  0x21   :  { %1474 = vmatpush.bf16.msrb.mxu3 %v1270_v39  ;;  %v1440_v39 = vld [vmem:[%s2670_s0 + $0xc] sm:$0xf] }
  0x22   :  { %672 = vmatpush.bf16.msrb.mxu2 %v1290_v28 }
  0x23   :  { %144 = vperm.xlu0 %1480, %v78_v5   ;;  %623 = vmatpush.bf16.msrb.mxu1 %v1286_v35  ;;  %v1896_v5 = vld [vmem:[%s2672_s3 + $0x8] sm:$0xff] }
  0x24   :  { %1376 = vmatmul.msk.bf16.gmra.mxu0 %vm346_vm0, %v1688_v3  ;;  %1382 = vmatmul.msk.bf16.gmra.mxu3 %vm346_vm0, %v1693_v4 }
  0x25   :  { %1475 = vmatpush.bf16.msra.mxu3 %v1536_v12  ;;  %1384 = vmatmul.msk.bf16.gmra.mxu1 %vm346_vm0, %v1688_v3  ;;  %v1451_v12 = vld [vmem:[%s2670_s0 + $0x60] sm:$0xf0] }
  0x26   :  { %v1310_v15 = vor.u32 %v1451_v12, %v1309_v11  ;;  %v780_v12 = vunpack.c.l.bf16 %v1896_v5 }
  0x27   :  { %1392 = vmatmul.msk.bf16.gmra.mxu2 %vm346_vm0, %v1688_v3 }
  0x28   :  { %149 = vperm.xlu1 %1481, %v79_v6   ;;  %573 = vmatpush.bf16.msrb.mxu0 %v1310_v15  ;;  %v718_v6 = vld [vmem:[%s2672_s3 + $0x1c] sm:$0xff] }
  0x29   :  { %1476 = vmatpush.bf16.msra.mxu3 %v1559_v21  ;;  %139 = vperm.xlu2 %1482, %v77_v18   ;;  %v1461_v21 = vld [vmem:[%s2670_s0 + $0xb4] sm:$0xf]  ;;  %v785_v13 = vunpack.c.l.bf16 %v718_v6  ;;  %v786_v16 = vunpack.c.h.bf16 %v718_v6 }
  0x2a   :  { %v1362_v24 = vor.u32 %v1461_v21, %v1359_v22 }
  0x2b   :  { %159 = vperm.xlu0 %1480, %v81_v14  }
  0x2c   :  { %574 = vmatpush.bf16.msrb.mxu0 %v1282_v33 }
  0x2d   :  { %1477 = vmatpush.bf16.msra.mxu3 %v1589_v32  ;;  %v1334_v32 = vor.u32 %v1454_v23, %v1331_v25  ;;  %v1920_v23 = vld [vmem:[%s2672_s3 + $0x16c] sm:$0xff] }
  0x2e   :  { %v869_v33 = vunpack.c.l.bf16 %v1920_v23 }
  0x31   :  { %1478 = vmatpush.bf16.msra.mxu3 %v1619_v43  ;;  %154 = vperm.xlu2 %1482, %v80_v20   ;;  %v1278_v43 = vor.u32 %v1440_v39, %v1275_v42  ;;  %v792_v39 = vunpack.c.l.bf16 %v722_v30 }
  0x34   :  { %1377 = vmatmul.msk.bf16.gmra.mxu0 %vm346_vm0, %v1743_v19  ;;  %1389 = vmatmul.msk.bf16.vlgmr.msrb.gmra.mxu3 %vm346_vm0, %v1624_v44 }
  0x35   :  { %1385 = vmatmul.msk.bf16.gmra.mxu1 %vm346_vm0, %v1743_v19  ;;  %522 = vmatpush.bf16.msrb.mxu3 %v1362_v24 }
  0x37   :  { %1393 = vmatmul.msk.bf16.gmra.mxu2 %vm346_vm0, %v1743_v19 }
  0x39   :  { %523 = vmatpush.bf16.msrb.mxu3 %v1334_v32 }
  0x3d   :  { %524 = vmatpush.bf16.msrb.mxu3 %v1306_v41 }
  0x41   :  { %525 = vmatpush.bf16.msrb.mxu3 %v1278_v43  ;;  %v793_v43 = vunpack.c.h.bf16 %v722_v30 }
  0x44   :  { %1378 = vmatmul.msk.bf16.gmra.mxu0 %vm346_vm0, %v1789_v36  ;;  %1390 = vmatmul.msk.bf16.gmra.mxu3 %vm346_vm0, %v1693_v4 }
  0x45   :  { %1386 = vmatmul.msk.bf16.gmra.mxu1 %vm346_vm0, %v1789_v36 }
  0x47   :  { %1394 = vmatmul.msk.bf16.gmra.mxu2 %vm346_vm0, %v1789_v36 }
  0x54   :  { %1379 = vmatmul.msk.bf16.gmra.mxu0 %vm346_vm0, %v1814_v45  ;;  %1397 = vmatmul.msk.bf16.vlgmr.msra.gmra.mxu3 %vm346_vm0, %v1624_v44 }
  0x55   :  { %1387 = vmatmul.msk.bf16.gmra.mxu1 %vm346_vm0, %v1814_v45 }
  0x57   :  { %1395 = vmatmul.msk.bf16.gmra.mxu2 %vm346_vm0, %v1814_v45 }
  0x64   :  { %1380 = vmatmul.msk.bf16.gmra.mxu0 %vm346_vm0, %v1827_v46  ;;  %1398 = vmatmul.msk.bf16.gmra.mxu3 %vm346_vm0, %v1693_v4 }
  0x65   :  { %1388 = vmatmul.msk.bf16.gmra.mxu1 %vm346_vm0, %v1827_v46 }
  0x67   :  { %1396 = vmatmul.msk.bf16.gmra.mxu2 %vm346_vm0, %v1827_v46 }
  0x6a   :  { %v1851_v50 = vpop.permute.xlu2 %104 }
  0x74   :  { %1399 = vmatmul.msk.bf16.vlgmr.msrb.gmra.mxu3 %vm346_vm0, %v1610_v40  ;;  %1407 = vmatmul.msk.bf16.vlgmr.msrb.gmra.mxu0 %vm346_vm0, %v1610_v40  ;;  %v1843_v47 = vpop.permute.xlu0 %84 }
  0x75   :  { %1415 = vmatmul.msk.bf16.vlgmr.msrb.gmra.mxu1 %vm346_vm0, %v1610_v40 }
  0x77   :  { %1423 = vmatmul.msk.bf16.vlgmr.msrb.gmra.mxu2 %vm346_vm0, %v1610_v40  ;;  %v1865_v40 = vpop.permute.xlu2 %109 }
  0x79   :  { %v1847_v48 = vpop.permute.xlu1 %94 }
  0x7d   :  { %v1849_v49 = vpop.permute.xlu0 %89 }
  0x7f   :  { %v1874_v59 = vpop.permute.xlu2 %124 }
  0x81   :  { %v1853_v51 = vpop.permute.xlu1 %99 }
  0x84   :  { %1400 = vmatmul.msk.bf16.gmra.mxu3 %vm346_vm0, %v1688_v3  ;;  %1408 = vmatmul.msk.bf16.gmra.mxu0 %vm346_vm0, %v1688_v3 }
  0x85   :  { %1416 = vmatmul.msk.bf16.gmra.mxu1 %vm346_vm0, %v1688_v3  ;;  %v1861_v52 = vpop.permute.xlu0 %114 }
  0x87   :  { %1424 = vmatmul.msk.bf16.gmra.mxu2 %vm346_vm0, %v1688_v3  ;;  %v1915_v22 = vpop.permute.xlu2 %139 }
  0x8a   :  { %v1867_v53 = vpop.permute.xlu1 %119 }
  0x8d   :  { %v1869_v54 = vpop.permute.xlu0 %129 }
  0x91   :  { %v380_v57 = vpop.f32.mrf.mxu0 }
  0x92   :  { %v381_v60 = vadd.f32 %v380_v57, %v1843_v47  ;;  %v429_v61 = vpop.f32.mrf.mxu1  ;;  %v1878_v63 = vpop.permute.xlu1 %134 }
  0x93   :  { %v430_v62 = vadd.f32 %v429_v61, %v1843_v47  ;;  %v1953_v61 = vld [vmem:[%s2672_s3 + $0x188] sm:$0xff] }
  0x94   :  { %v890_v1 = vadd.f32 %v778_v56, %v381_v60  ;;  %1401 = vmatmul.msk.bf16.gmra.mxu3 %vm346_vm0, %v1743_v19  ;;  %1409 = vmatmul.msk.bf16.gmra.mxu0 %vm346_vm0, %v1743_v19 }
  0x95   :  { %v891_v2 = vadd.f32 %v779_v58, %v430_v62  ;;  %1417 = vmatmul.msk.bf16.gmra.mxu1 %vm346_vm0, %v1743_v19  ;;  %v1891_v3 = vpop.permute.xlu0 %144 }
  0x96   :  { %v1002_v7 = vmax.f32 %v890_v1, 0.0 }
  0x97   :  { %1425 = vmatmul.msk.bf16.gmra.mxu2 %vm346_vm0, %v1743_v19  ;;  %v1003_v9 = vmax.f32 %v891_v2, 0.0  ;;  %v410_v10 = vpop.f32.mrf.mxu3 }
  0x98   :  { %1114 = vst [vmem:[%s2673_s4] sm:$0xff] %v1002_v7  ;;  %v411_v11 = vadd.f32 %v410_v10, %v1891_v3  ;;  %v1961_v7 = vpop.permute.xlu2 %154 }
  0x99   :  { %1115 = vst [vmem:[%s2673_s4 + $0x8] sm:$0xff] %v1003_v9  ;;  %v382_v15 = vpop.f32.mrf.mxu0  ;;  %v726_v9 = vld [vmem:[%s2672_s3 + $0x54] sm:$0xff] }
  0x9a   :  { %v478_v14 = vpop.f32.mrf.mxu2  ;;  %v974_v17 = vadd.f32 %v862_v8, %v411_v11  ;;  %v383_v19 = vadd.f32 %v382_v15, %v1849_v49  ;;  %v431_v20 = vpop.f32.mrf.mxu1  ;;  %v1966_v8 = vld [vmem:[%s2672_s3 + $0x40] sm:$0xff] }
  0x9b   :  { %v479_v18 = vadd.f32 %v478_v14, %v1843_v47  ;;  %v432_v21 = vadd.f32 %v431_v20, %v1849_v49  ;;  %v1922_v28 = vpop.permute.xlu1 %149 }
  0x9c   :  { %v1086_v24 = vmax.f32 %v974_v17, 0.0  ;;  %v897_v26 = vadd.f32 %v785_v13, %v383_v19  ;;  %v799_v17 = vunpack.c.l.bf16 %v726_v9 }
  0x9d   :  { %v892_v25 = vadd.f32 %v780_v12, %v479_v18  ;;  %v898_v27 = vadd.f32 %v786_v16, %v432_v21  ;;  %v876_v12 = vunpack.c.l.bf16 %v1953_v61  ;;  %v794_v16 = vunpack.c.l.bf16 %v1966_v8 }
  0x9e   :  { %1199 = vst [vmem:[%s2673_s4 + $0x2a0] sm:$0xff] %v1086_v24  ;;  %v1009_v32 = vmax.f32 %v897_v26, 0.0 }
  0x9f   :  { %v1004_v31 = vmax.f32 %v892_v25, 0.0  ;;  %v1010_v34 = vmax.f32 %v898_v27, 0.0  ;;  %v412_v35 = vpop.f32.mrf.mxu3  ;;  %v1994_v27 = vld [vmem:[%s2672_s3 + $0x1a4] sm:$0xff] }
  0xa0   :  { %v413_v37 = vadd.f32 %v412_v35, %v1922_v28  ;;  %1122 = vst [vmem:[%s2673_s4 + $0x38] sm:$0xff] %v1009_v32  ;;  %v2001_v35 = vld [vmem:[%s2672_s3 + $0x5c] sm:$0xff] }
  0xa1   :  { %1116 = vst [vmem:[%s2673_s4 + $0x10] sm:$0xff] %v1004_v31  ;;  %v385_v42 = vpop.f32.mrf.mxu0 }
  0xa2   :  { %v480_v41 = vpop.f32.mrf.mxu2  ;;  %1123 = vst [vmem:[%s2673_s4 + $0x40] sm:$0xff] %v1010_v34  ;;  %v981_v55 = vadd.f32 %v869_v33, %v413_v37  ;;  %v386_v57 = vadd.f32 %v385_v42, %v1847_v48  ;;  %v434_v58 = vpop.f32.mrf.mxu1  ;;  %v730_v37 = vld [vmem:[%s2672_s3 + $0x70] sm:$0xff] }
  0xa3   :  { %v481_v56 = vadd.f32 %v480_v41, %v1849_v49  ;;  %v435_v60 = vadd.f32 %v434_v58, %v1847_v48  ;;  %v1996_v34 = vpop.permute.xlu0 %159  ;;  %v883_v41 = vunpack.c.l.bf16 %v1994_v27 }
  0xa4   :  { %v1093_v62 = vmax.f32 %v981_v55, 0.0  ;;  %v904_v2 = vadd.f32 %v792_v39, %v386_v57  ;;  %1402 = vmatmul.msk.bf16.gmra.mxu3 %vm346_vm0, %v1789_v36  ;;  %1410 = vmatmul.msk.bf16.gmra.mxu0 %vm346_vm0, %v1789_v36  ;;  %v806_v57 = vunpack.c.l.bf16 %v730_v37 }
  0xa5   :  { %v899_v1 = vadd.f32 %v787_v38, %v481_v56  ;;  %v905_v6 = vadd.f32 %v793_v43, %v435_v60  ;;  %1418 = vmatmul.msk.bf16.gmra.mxu1 %vm346_vm0, %v1789_v36  ;;  %v801_v56 = vunpack.c.l.bf16 %v2001_v35 }
  0xa6   :  { %1206 = vst [vmem:[%s2673_s4 + $0x2d8] sm:$0xff] %v1093_v62  ;;  %v1016_v11 = vmax.f32 %v904_v2, 0.0  ;;  %v807_v62 = vunpack.c.h.bf16 %v730_v37 }
  0xa7   :  { %v1011_v10 = vmax.f32 %v899_v1, 0.0  ;;  %1426 = vmatmul.msk.bf16.gmra.mxu2 %vm346_vm0, %v1789_v36  ;;  %v1017_v13 = vmax.f32 %v905_v6, 0.0  ;;  %v415_v14 = vpop.f32.mrf.mxu3  ;;  %v800_v36 = vunpack.c.h.bf16 %v726_v9 }
  0xa8   :  { %v416_v15 = vadd.f32 %v415_v14, %v1961_v7  ;;  %1129 = vst [vmem:[%s2673_s4 + $0x70] sm:$0xff] %v1016_v11 }
  0xa9   :  { %1124 = vst [vmem:[%s2673_s4 + $0x48] sm:$0xff] %v1011_v10  ;;  %v387_v19 = vpop.f32.mrf.mxu0 }
  0xaa   :  { %v483_v18 = vpop.f32.mrf.mxu2  ;;  %1130 = vst [vmem:[%s2673_s4 + $0x78] sm:$0xff] %v1017_v13  ;;  %v988_v20 = vadd.f32 %v876_v12, %v416_v15  ;;  %v388_v24 = vadd.f32 %v387_v19, %v1853_v51  ;;  %v436_v25 = vpop.f32.mrf.mxu1  ;;  %v2033_v15 = vld [vmem:[%s2672_s3 + $0x78] sm:$0xff]  ;;  %v863_v19 = vunpack.c.h.bf16 %v1883_v0 }
  0xab   :  { %v484_v21 = vadd.f32 %v483_v18, %v1847_v48  ;;  %v437_v26 = vadd.f32 %v436_v25, %v1853_v51 }
  0xac   :  { %v1100_v30 = vmax.f32 %v988_v20, 0.0  ;;  %v911_v32 = vadd.f32 %v799_v17, %v388_v24  ;;  %v808_v24 = vunpack.c.l.bf16 %v2033_v15 }
  0xad   :  { %v906_v31 = vadd.f32 %v794_v16, %v484_v21  ;;  %v912_v33 = vadd.f32 %v800_v36, %v437_v26  ;;  %v734_v16 = vld [vmem:[%s2672_s3 + $0x8c] sm:$0xff] }
  0xae   :  { %1213 = vst [vmem:[%s2673_s4 + $0x310] sm:$0xff] %v1100_v30  ;;  %v1023_v39 = vmax.f32 %v911_v32, 0.0  ;;  %v813_v25 = vunpack.c.l.bf16 %v734_v16 }
  0xaf   :  { %v1018_v38 = vmax.f32 %v906_v31, 0.0  ;;  %v1024_v42 = vmax.f32 %v912_v33, 0.0  ;;  %v417_v43 = vpop.f32.mrf.mxu3 }
  0xb0   :  { %v418_v55 = vadd.f32 %v417_v43, %v1996_v34  ;;  %1136 = vst [vmem:[%s2673_s4 + $0xa8] sm:$0xff] %v1023_v39  ;;  %v2061_v43 = vld [vmem:[%s2672_s3 + $0x94] sm:$0xff] }
  0xb1   :  { %1131 = vst [vmem:[%s2673_s4 + $0x80] sm:$0xff] %v1018_v38  ;;  %v390_v60 = vpop.f32.mrf.mxu0 }
  0xb2   :  { %v485_v58 = vpop.f32.mrf.mxu2  ;;  %1137 = vst [vmem:[%s2673_s4 + $0xb0] sm:$0xff] %v1024_v42  ;;  %v995_v1 = vadd.f32 %v883_v41, %v418_v55  ;;  %v391_v6 = vadd.f32 %v390_v60, %v1851_v50  ;;  %v439_v9 = vpop.f32.mrf.mxu1  ;;  %v738_v55 = vld [vmem:[%s2672_s3 + $0xa8] sm:$0xff] }
  0xb3   :  { %v486_v2 = vadd.f32 %v485_v58, %v1853_v51  ;;  %v440_v10 = vadd.f32 %v439_v9, %v1851_v50  ;;  %v870_v58 = vunpack.c.h.bf16 %v1920_v23 }
  0xb4   :  { %v1107_v11 = vmax.f32 %v995_v1, 0.0  ;;  %v918_v13 = vadd.f32 %v806_v57, %v391_v6  ;;  %1403 = vmatmul.msk.bf16.gmra.mxu3 %vm346_vm0, %v1814_v45  ;;  %1411 = vmatmul.msk.bf16.gmra.mxu0 %vm346_vm0, %v1814_v45  ;;  %v820_v6 = vunpack.c.l.bf16 %v738_v55 }
  0xb5   :  { %v913_v12 = vadd.f32 %v801_v56, %v486_v2  ;;  %v919_v14 = vadd.f32 %v807_v62, %v440_v10  ;;  %1419 = vmatmul.msk.bf16.gmra.mxu1 %vm346_vm0, %v1814_v45  ;;  %v815_v2 = vunpack.c.l.bf16 %v2061_v43 }
  0xb6   :  { %1220 = vst [vmem:[%s2673_s4 + $0x348] sm:$0xff] %v1107_v11  ;;  %v1030_v18 = vmax.f32 %v918_v13, 0.0  ;;  %v821_v11 = vunpack.c.h.bf16 %v738_v55 }
  0xb7   :  { %v1025_v17 = vmax.f32 %v913_v12, 0.0  ;;  %1427 = vmatmul.msk.bf16.gmra.mxu2 %vm346_vm0, %v1814_v45  ;;  %v1031_v36 = vmax.f32 %v919_v14, 0.0  ;;  %v459_v20 = vpop.f32.mrf.mxu3  ;;  %v814_v45 = vunpack.c.h.bf16 %v734_v16 }
  0xb8   :  { %v460_v21 = vadd.f32 %v459_v20, %v1891_v3  ;;  %1143 = vst [vmem:[%s2673_s4 + $0xe0] sm:$0xff] %v1030_v18  ;;  %v2093_v20 = vld [vmem:[%s2672_s3 + $0xb0] sm:$0xff] }
  0xb9   :  { %1138 = vst [vmem:[%s2673_s4 + $0xb8] sm:$0xff] %v1025_v17  ;;  %v392_v30 = vpop.f32.mrf.mxu0 }
  0xba   :  { %v488_v26 = vpop.f32.mrf.mxu2  ;;  %1144 = vst [vmem:[%s2673_s4 + $0xe8] sm:$0xff] %v1031_v36  ;;  %v975_v0 = vadd.f32 %v863_v19, %v460_v21  ;;  %v393_v32 = vadd.f32 %v392_v30, %v1865_v40  ;;  %v441_v33 = vpop.f32.mrf.mxu1  ;;  %v742_v21 = vld [vmem:[%s2672_s3 + $0xc4] sm:$0xff] }
  0xbb   :  { %v489_v31 = vadd.f32 %v488_v26, %v1851_v50  ;;  %v442_v37 = vadd.f32 %v441_v33, %v1865_v40  ;;  %v877_v26 = vunpack.c.h.bf16 %v1953_v61 }
  0xbc   :  { %v1087_v38 = vmax.f32 %v975_v0, 0.0  ;;  %v925_v41 = vadd.f32 %v813_v25, %v393_v32  ;;  %v827_v32 = vunpack.c.l.bf16 %v742_v21 }
  0xbd   :  { %v920_v39 = vadd.f32 %v808_v24, %v489_v31  ;;  %v926_v42 = vadd.f32 %v814_v45, %v442_v37  ;;  %v822_v31 = vunpack.c.l.bf16 %v2093_v20 }
  0xbe   :  { %1200 = vst [vmem:[%s2673_s4 + $0x2a8] sm:$0xff] %v1087_v38  ;;  %v1037_v57 = vmax.f32 %v925_v41, 0.0 }
  0xbf   :  { %v1032_v56 = vmax.f32 %v920_v39, 0.0  ;;  %v1038_v60 = vmax.f32 %v926_v42, 0.0  ;;  %v461_v62 = vpop.f32.mrf.mxu3 }
  0xc0   :  { %v462_v1 = vadd.f32 %v461_v62, %v1922_v28  ;;  %1150 = vst [vmem:[%s2673_s4 + $0x118] sm:$0xff] %v1037_v57  ;;  %v746_v62 = vld [vmem:[%s2672_s3 + $0xe0] sm:$0xff] }
  0xc1   :  { %1145 = vst [vmem:[%s2673_s4 + $0xf0] sm:$0xff] %v1032_v56  ;;  %v395_v10 = vpop.f32.mrf.mxu0 }
  0xc2   :  { %v490_v9 = vpop.f32.mrf.mxu2  ;;  %1151 = vst [vmem:[%s2673_s4 + $0x120] sm:$0xff] %v1038_v60  ;;  %v982_v23 = vadd.f32 %v870_v58, %v462_v1  ;;  %v396_v13 = vadd.f32 %v395_v10, %v1861_v52  ;;  %v444_v14 = vpop.f32.mrf.mxu1  ;;  %v2121_v60 = vld [vmem:[%s2672_s3 + $0xcc] sm:$0xff] }
  0xc3   :  { %v491_v12 = vadd.f32 %v490_v9, %v1865_v40  ;;  %v445_v16 = vadd.f32 %v444_v14, %v1861_v52 }
  0xc4   :  { %v1094_v17 = vmax.f32 %v982_v23, 0.0  ;;  %v932_v19 = vadd.f32 %v820_v6, %v396_v13  ;;  %1404 = vmatmul.msk.bf16.gmra.mxu3 %vm346_vm0, %v1827_v46  ;;  %1412 = vmatmul.msk.bf16.gmra.mxu0 %vm346_vm0, %v1827_v46  ;;  %v884_v6 = vunpack.c.h.bf16 %v1994_v27  ;;  %v829_v23 = vunpack.c.l.bf16 %v2121_v60 }
  0xc5   :  { %v927_v18 = vadd.f32 %v815_v2, %v491_v12  ;;  %v933_v36 = vadd.f32 %v821_v11, %v445_v16  ;;  %1420 = vmatmul.msk.bf16.gmra.mxu1 %vm346_vm0, %v1827_v46  ;;  %v834_v12 = vunpack.c.l.bf16 %v746_v62  ;;  %v835_v16 = vunpack.c.h.bf16 %v746_v62 }
  0xc6   :  { %1207 = vst [vmem:[%s2673_s4 + $0x2e0] sm:$0xff] %v1094_v17  ;;  %v1044_v25 = vmax.f32 %v932_v19, 0.0 }
  0xc7   :  { %v1039_v24 = vmax.f32 %v927_v18, 0.0  ;;  %1428 = vmatmul.msk.bf16.gmra.mxu2 %vm346_vm0, %v1827_v46  ;;  %v1045_v30 = vmax.f32 %v933_v36, 0.0  ;;  %v464_v45 = vpop.f32.mrf.mxu3  ;;  %v828_v46 = vunpack.c.h.bf16 %v742_v21  ;;  %v2147_v21 = vld [vmem:[%s2672_s3 + $0x158] sm:$0xff] }
  0xc8   :  { %v465_v0 = vadd.f32 %v464_v45, %v1961_v7  ;;  %1157 = vst [vmem:[%s2673_s4 + $0x150] sm:$0xff] %v1044_v25  ;;  %v2158_v45 = vld [vmem:[%s2672_s3 + $0xe8] sm:$0xff] }
  0xc9   :  { %1152 = vst [vmem:[%s2673_s4 + $0x128] sm:$0xff] %v1039_v24  ;;  %v397_v37 = vpop.f32.mrf.mxu0 }
  0xca   :  { %v493_v33 = vpop.f32.mrf.mxu2  ;;  %1158 = vst [vmem:[%s2673_s4 + $0x158] sm:$0xff] %v1045_v30  ;;  %v989_v61 = vadd.f32 %v877_v26, %v465_v0  ;;  %v398_v39 = vadd.f32 %v397_v37, %v1867_v53  ;;  %v446_v41 = vpop.f32.mrf.mxu1  ;;  %v750_v0 = vld [vmem:[%s2672_s3 + $0xfc] sm:$0xff] }
  0xcb   :  { %v494_v38 = vadd.f32 %v493_v33, %v1861_v52  ;;  %v447_v42 = vadd.f32 %v446_v41, %v1867_v53  ;;  %v864_v33 = vunpack.c.l.bf16 %v2147_v21 }
  0xcc   :  { %v1101_v55 = vmax.f32 %v989_v61, 0.0  ;;  %v939_v57 = vadd.f32 %v827_v32, %v398_v39  ;;  %v836_v61 = vunpack.c.l.bf16 %v2158_v45  ;;  %v841_v39 = vunpack.c.l.bf16 %v750_v0 }
  0xcd   :  { %v934_v56 = vadd.f32 %v822_v31, %v494_v38  ;;  %v940_v58 = vadd.f32 %v828_v46, %v447_v42 }
  0xce   :  { %1214 = vst [vmem:[%s2673_s4 + $0x318] sm:$0xff] %v1101_v55  ;;  %v1051_v2 = vmax.f32 %v939_v57, 0.0 }
  0xcf   :  { %v1046_v1 = vmax.f32 %v934_v56, 0.0  ;;  %v1052_v9 = vmax.f32 %v940_v58, 0.0  ;;  %v466_v10 = vpop.f32.mrf.mxu3 }
  0xd0   :  { %v467_v11 = vadd.f32 %v466_v10, %v1996_v34  ;;  %1164 = vst [vmem:[%s2673_s4 + $0x188] sm:$0xff] %v1051_v2 }
  0xd1   :  { %1159 = vst [vmem:[%s2673_s4 + $0x160] sm:$0xff] %v1046_v1  ;;  %v400_v14 = vpop.f32.mrf.mxu0  ;;  %v2186_v1 = vld [vmem:[%s2672_s3 + $0x174] sm:$0xff] }
  0xd2   :  { %v495_v13 = vpop.f32.mrf.mxu2  ;;  %1165 = vst [vmem:[%s2673_s4 + $0x190] sm:$0xff] %v1052_v9  ;;  %v996_v27 = vadd.f32 %v884_v6, %v467_v11  ;;  %v401_v18 = vadd.f32 %v400_v14, %v1874_v59  ;;  %v449_v19 = vpop.f32.mrf.mxu1  ;;  %v2191_v11 = vld [vmem:[%s2672_s3 + $0x104] sm:$0xff]  ;;  %v871_v14 = vunpack.c.l.bf16 %v2186_v1 }
  0xd3   :  { %v496_v17 = vadd.f32 %v495_v13, %v1867_v53  ;;  %v450_v36 = vadd.f32 %v449_v19, %v1874_v59 }
  0xd4   :  { %v1108_v24 = vmax.f32 %v996_v27, 0.0  ;;  %v946_v26 = vadd.f32 %v834_v12, %v401_v18  ;;  %1405 = vmatmul.msk.bf16.gmra.mxu3 %vm346_vm0, %v1624_v44  ;;  %1413 = vmatmul.msk.bf16.gmra.mxu0 %vm346_vm0, %v1624_v44 }
  0xd5   :  { %v941_v25 = vadd.f32 %v829_v23, %v496_v17  ;;  %v947_v30 = vadd.f32 %v835_v16, %v450_v36  ;;  %1421 = vmatmul.msk.bf16.gmra.mxu1 %vm346_vm0, %v1624_v44  ;;  %v754_v23 = vld [vmem:[%s2672_s3 + $0x118] sm:$0xff]  ;;  %v843_v17 = vunpack.c.l.bf16 %v2191_v11 }
  0xd6   :  { %1221 = vst [vmem:[%s2673_s4 + $0x350] sm:$0xff] %v1108_v24  ;;  %v1058_v32 = vmax.f32 %v946_v26, 0.0  ;;  %v848_v19 = vunpack.c.l.bf16 %v754_v23 }
  0xd7   :  { %v1053_v31 = vmax.f32 %v941_v25, 0.0  ;;  %1429 = vmatmul.msk.bf16.gmra.mxu2 %vm346_vm0, %v1624_v44  ;;  %v1059_v37 = vmax.f32 %v947_v30, 0.0  ;;  %v508_v46 = vpop.f32.mrf.mxu3  ;;  %v842_v44 = vunpack.c.h.bf16 %v750_v0  ;;  %v849_v25 = vunpack.c.h.bf16 %v754_v23 }
  0xd8   :  { %v509_v38 = vadd.f32 %v508_v46, %v1891_v3  ;;  %1171 = vst [vmem:[%s2673_s4 + $0x1c0] sm:$0xff] %v1058_v32 }
  0xd9   :  { %1166 = vst [vmem:[%s2673_s4 + $0x198] sm:$0xff] %v1053_v31  ;;  %v402_v42 = vpop.f32.mrf.mxu0 }
  0xda   :  { %v498_v41 = vpop.f32.mrf.mxu2  ;;  %1172 = vst [vmem:[%s2673_s4 + $0x1c8] sm:$0xff] %v1059_v37  ;;  %v976_v56 = vadd.f32 %v864_v33, %v509_v38  ;;  %v403_v57 = vadd.f32 %v402_v42, %v1869_v54  ;;  %v451_v58 = vpop.f32.mrf.mxu1  ;;  %v2217_v33 = vld [vmem:[%s2672_s3 + $0x190] sm:$0xff] }
  0xdb   :  { %v499_v55 = vadd.f32 %v498_v41, %v1874_v59  ;;  %v452_v62 = vadd.f32 %v451_v58, %v1869_v54  ;;  %v758_v41 = vld [vmem:[%s2672_s3 + $0x134] sm:$0xff] }
  0xdc   :  { %v1088_v6 = vmax.f32 %v976_v56, 0.0  ;;  %v953_v9 = vadd.f32 %v841_v39, %v403_v57  ;;  %v2228_v39 = vld [vmem:[%s2672_s3 + $0x120] sm:$0xff] }
  0xdd   :  { %v948_v2 = vadd.f32 %v836_v61, %v499_v55  ;;  %v954_v10 = vadd.f32 %v842_v44, %v452_v62  ;;  %v878_v55 = vunpack.c.l.bf16 %v2217_v33  ;;  %v850_v58 = vunpack.c.l.bf16 %v2228_v39 }
  0xde   :  { %1201 = vst [vmem:[%s2673_s4 + $0x2b0] sm:$0xff] %v1088_v6  ;;  %v1065_v13 = vmax.f32 %v953_v9, 0.0 }
  0xdf   :  { %v1060_v12 = vmax.f32 %v948_v2, 0.0  ;;  %v1066_v16 = vmax.f32 %v954_v10, 0.0  ;;  %v510_v27 = vpop.f32.mrf.mxu3  ;;  %v855_v2 = vunpack.c.l.bf16 %v758_v41 }
  0xe0   :  { %v511_v18 = vadd.f32 %v510_v27, %v1922_v28  ;;  %1178 = vst [vmem:[%s2673_s4 + $0x1f8] sm:$0xff] %v1065_v13 }
  0xe1   :  { %1173 = vst [vmem:[%s2673_s4 + $0x1d0] sm:$0xff] %v1060_v12  ;;  %v405_v24 = vpop.f32.mrf.mxu0 }
  0xe2   :  { %v500_v36 = vpop.f32.mrf.mxu2  ;;  %1179 = vst [vmem:[%s2673_s4 + $0x200] sm:$0xff] %v1066_v16  ;;  %v983_v30 = vadd.f32 %v871_v14, %v511_v18  ;;  %v406_v0 = vadd.f32 %v405_v24, %v1878_v63  ;;  %v454_v31 = vpop.f32.mrf.mxu1  ;;  %v2256_v16 = vld [vmem:[%s2672_s3 + $0x1ac] sm:$0xff] }
  0xe3   :  { %v501_v26 = vadd.f32 %v500_v36, %v1869_v54  ;;  %v455_v32 = vadd.f32 %v454_v31, %v1878_v63  ;;  %v2261_v36 = vld [vmem:[%s2672_s3 + $0x13c] sm:$0xff]  ;;  %v716_v24 = vld [vmem:[%s2672_s3 + $0x10] sm:$0xff] }
  0xe4   :  { %v1095_v46 = vmax.f32 %v983_v30, 0.0  ;;  %v960_v61 = vadd.f32 %v848_v19, %v406_v0  ;;  %1406 = vmatmul.msk.bf16.gmra.mxu3 %vm346_vm0, %v1693_v4  ;;  %1414 = vmatmul.msk.bf16.gmra.mxu0 %vm346_vm0, %v1693_v4  ;;  %v885_v30 = vunpack.c.l.bf16 %v2256_v16 }
  0xe5   :  { %v955_v37 = vadd.f32 %v843_v17, %v501_v26  ;;  %v961_v38 = vadd.f32 %v849_v25, %v455_v32  ;;  %1422 = vmatmul.msk.bf16.gmra.mxu1 %vm346_vm0, %v1693_v4  ;;  %v857_v32 = vunpack.c.l.bf16 %v2261_v36 }
  0xe6   :  { %1208 = vst [vmem:[%s2673_s4 + $0x2e8] sm:$0xff] %v1095_v46  ;;  %v1072_v44 = vmax.f32 %v960_v61, 0.0  ;;  %v782_v46 = vunpack.c.l.bf16 %v716_v24 }
  0xe7   :  { %v1067_v42 = vmax.f32 %v955_v37, 0.0  ;;  %1430 = vmatmul.msk.bf16.gmra.mxu2 %vm346_vm0, %v1693_v4  ;;  %v1073_v56 = vmax.f32 %v961_v38, 0.0  ;;  %v513_v57 = vpop.f32.mrf.mxu3  ;;  %v856_v4 = vunpack.c.h.bf16 %v758_v41  ;;  %v783_v41 = vunpack.c.h.bf16 %v716_v24 }
  0xe8   :  { %v514_v62 = vadd.f32 %v513_v57, %v1961_v7  ;;  %1185 = vst [vmem:[%s2673_s4 + $0x230] sm:$0xff] %v1072_v44 }
  0xe9   :  { %1180 = vst [vmem:[%s2673_s4 + $0x208] sm:$0xff] %v1067_v42  ;;  %v407_v9 = vpop.f32.mrf.mxu0 }
  0xea   :  { %v503_v6 = vpop.f32.mrf.mxu2  ;;  %1186 = vst [vmem:[%s2673_s4 + $0x238] sm:$0xff] %v1073_v56  ;;  %v990_v23 = vadd.f32 %v878_v55, %v514_v62  ;;  %v408_v12 = vadd.f32 %v407_v9, %v1915_v22  ;;  %v456_v13 = vpop.f32.mrf.mxu1  ;;  %v717_v9 = vld [vmem:[%s2672_s3 + $0x18] sm:$0xf] }
  0xeb   :  { %v504_v10 = vadd.f32 %v503_v6, %v1878_v63  ;;  %v457_v14 = vadd.f32 %v456_v13, %v1915_v22 }
  0xec   :  { %v1102_v17 = vmax.f32 %v990_v23, 0.0  ;;  %v967_v18 = vadd.f32 %v855_v2, %v408_v12  ;;  %v781_v12 = vunpack.c.h.bf16 %v1896_v5 }
  0xed   :  { %v962_v27 = vadd.f32 %v850_v58, %v504_v10  ;;  %v968_v19 = vadd.f32 %v856_v4, %v457_v14  ;;  %v720_v4 = vld [vmem:[%s2672_s3 + $0x2c] sm:$0xff] }
  0xee   :  { %1215 = vst [vmem:[%s2673_s4 + $0x320] sm:$0xff] %v1102_v17  ;;  %v1079_v26 = vmax.f32 %v967_v18, 0.0  ;;  %v784_v17 = vunpack.c.l.bf16 %v717_v9  ;;  %v789_v18 = vunpack.c.l.bf16 %v720_v4 }
  0xef   :  { %v1074_v25 = vmax.f32 %v962_v27, 0.0  ;;  %v1080_v0 = vmax.f32 %v968_v19, 0.0  ;;  %v515_v31 = vpop.f32.mrf.mxu3 }
  0xf0   :  { %v516_v37 = vadd.f32 %v515_v31, %v1996_v34  ;;  %1192 = vst [vmem:[%s2673_s4 + $0x268] sm:$0xff] %v1079_v26 }
  0xf1   :  { %1187 = vst [vmem:[%s2673_s4 + $0x240] sm:$0xff] %v1074_v25  ;;  %v576_v38 = vpop.f32.mrf.mxu0  ;;  %v790_v25 = vunpack.c.h.bf16 %v720_v4 }
  0xf2   :  { %v505_v61 = vpop.f32.mrf.mxu2  ;;  %1193 = vst [vmem:[%s2673_s4 + $0x270] sm:$0xff] %v1080_v0  ;;  %v997_v44 = vadd.f32 %v885_v30, %v516_v37  ;;  %v577_v55 = vadd.f32 %v576_v38, %v1843_v47  ;;  %v625_v56 = vpop.f32.mrf.mxu1  ;;  %v721_v38 = vld [vmem:[%s2672_s3 + $0x34] sm:$0xf] }
  0xf3   :  { %v506_v42 = vadd.f32 %v505_v61, %v1915_v22  ;;  %v626_v57 = vadd.f32 %v625_v56, %v1843_v47 }
  0xf4   :  { %v1109_v62 = vmax.f32 %v997_v44, 0.0  ;;  %v894_v2 = vadd.f32 %v782_v46, %v577_v55  ;;  %v788_v44 = vunpack.c.h.bf16 %v1927_v29 }
  0xf5   :  { %v969_v58 = vadd.f32 %v857_v32, %v506_v42  ;;  %v895_v6 = vadd.f32 %v783_v41, %v626_v57  ;;  %v724_v41 = vld [vmem:[%s2672_s3 + $0x48] sm:$0xff] }
  0xf6   :  { %1222 = vst [vmem:[%s2673_s4 + $0x358] sm:$0xff] %v1109_v62  ;;  %v1006_v23 = vmax.f32 %v894_v2, 0.0  ;;  %v796_v62 = vunpack.c.l.bf16 %v724_v41  ;;  %v797_v9 = vunpack.c.h.bf16 %v724_v41 }
  0xf7   :  { %v1081_v10 = vmax.f32 %v969_v58, 0.0  ;;  %v1007_v13 = vmax.f32 %v895_v6, 0.0  ;;  %v527_v14 = vpop.f32.mrf.mxu3  ;;  %v791_v58 = vunpack.c.l.bf16 %v721_v38 }
  0xf8   :  { %v528_v27 = vadd.f32 %v527_v14, %v1843_v47  ;;  %1118 = vst [vmem:[%s2673_s4 + $0x20] sm:$0xff] %v1006_v23 }
  0xf9   :  { %1194 = vst [vmem:[%s2673_s4 + $0x278] sm:$0xff] %v1081_v10  ;;  %v578_v24 = vpop.f32.mrf.mxu0 }
  0xfa   :  { %v674_v19 = vpop.f32.mrf.mxu2  ;;  %1119 = vst [vmem:[%s2673_s4 + $0x28] sm:$0xff] %v1007_v13  ;;  %v893_v5 = vadd.f32 %v781_v12, %v528_v27  ;;  %v579_v30 = vadd.f32 %v578_v24, %v1849_v49  ;;  %v627_v0 = vpop.f32.mrf.mxu1 }
  0xfb   :  { %v675_v26 = vadd.f32 %v674_v19, %v1843_v47  ;;  %v628_v31 = vadd.f32 %v627_v0, %v1849_v49  ;;  %v728_v19 = vld [vmem:[%s2672_s3 + $0x64] sm:$0xff] }
  0xfc   :  { %v1005_v32 = vmax.f32 %v893_v5, 0.0  ;;  %v901_v46 = vadd.f32 %v789_v18, %v579_v30  ;;  %v725_v18 = vld [vmem:[%s2672_s3 + $0x50] sm:$0xf] }
  0xfd   :  { %v896_v37 = vadd.f32 %v784_v17, %v675_v26  ;;  %v902_v61 = vadd.f32 %v790_v25, %v628_v31  ;;  %v795_v25 = vunpack.c.h.bf16 %v1966_v8  ;;  %v798_v0 = vunpack.c.l.bf16 %v725_v18 }
  0xfe   :  { %1117 = vst [vmem:[%s2673_s4 + $0x18] sm:$0xff] %v1005_v32  ;;  %v1013_v42 = vmax.f32 %v901_v46, 0.0  ;;  %v803_v31 = vunpack.c.l.bf16 %v728_v19  ;;  %v804_v46 = vunpack.c.h.bf16 %v728_v19 }
  0xff   :  { %v1008_v47 = vmax.f32 %v896_v37, 0.0  ;;  %v1014_v55 = vmax.f32 %v902_v61, 0.0  ;;  %v529_v56 = vpop.f32.mrf.mxu3 }
 0x100   :  { %v530_v57 = vadd.f32 %v529_v56, %v1849_v49  ;;  %1126 = vst [vmem:[%s2673_s4 + $0x58] sm:$0xff] %v1013_v42 }
 0x101   :  { %1121 = vst.msk [vmem:[%s2673_s4 + $0x30] sm:$0xff] %vm1120_vm1, %v1008_v47  ;;  %v581_v6 = vpop.f32.mrf.mxu0 }
 0x102   :  { %v676_v2 = vpop.f32.mrf.mxu2  ;;  %1127 = vst [vmem:[%s2673_s4 + $0x60] sm:$0xff] %v1014_v55  ;;  %v900_v29 = vadd.f32 %v788_v44, %v530_v57  ;;  %v582_v10 = vadd.f32 %v581_v6, %v1847_v48  ;;  %v630_v23 = vpop.f32.mrf.mxu1  ;;  %v729_v57 = vld [vmem:[%s2672_s3 + $0x6c] sm:$0xf] }
 0x103   :  { %v677_v4 = vadd.f32 %v676_v2, %v1849_v49  ;;  %v631_v12 = vadd.f32 %v630_v23, %v1847_v48  ;;  %v802_v2 = vunpack.c.h.bf16 %v2001_v35 }
 0x104   :  { %v1012_v13 = vmax.f32 %v900_v29, 0.0  ;;  %v908_v27 = vadd.f32 %v796_v62, %v582_v10 }
 0x105   :  { %v903_v14 = vadd.f32 %v791_v58, %v677_v4  ;;  %v909_v17 = vadd.f32 %v797_v9, %v631_v12  ;;  %v732_v58 = vld [vmem:[%s2672_s3 + $0x80] sm:$0xff]  ;;  %v805_v4 = vunpack.c.l.bf16 %v729_v57 }
 0x106   :  { %1125 = vst [vmem:[%s2673_s4 + $0x50] sm:$0xff] %v1012_v13  ;;  %v1020_v24 = vmax.f32 %v908_v27, 0.0  ;;  %v810_v10 = vunpack.c.l.bf16 %v732_v58  ;;  %v811_v13 = vunpack.c.h.bf16 %v732_v58 }
 0x107   :  { %v1015_v49 = vmax.f32 %v903_v14, 0.0  ;;  %v1021_v5 = vmax.f32 %v909_v17, 0.0  ;;  %v532_v26 = vpop.f32.mrf.mxu3 }
 0x108   :  { %v533_v30 = vadd.f32 %v532_v26, %v1847_v48  ;;  %1133 = vst [vmem:[%s2673_s4 + $0x90] sm:$0xff] %v1020_v24  ;;  %v736_v26 = vld [vmem:[%s2672_s3 + $0x9c] sm:$0xff] }
 0x109   :  { %1128 = vst.msk [vmem:[%s2673_s4 + $0x68] sm:$0xff] %vm1120_vm1, %v1015_v49  ;;  %v583_v37 = vpop.f32.mrf.mxu0 }
 0x10a   :  { %v679_v32 = vpop.f32.mrf.mxu2  ;;  %1134 = vst [vmem:[%s2673_s4 + $0x98] sm:$0xff] %v1021_v5  ;;  %v907_v8 = vadd.f32 %v795_v25, %v533_v30  ;;  %v584_v38 = vadd.f32 %v583_v37, %v1853_v51  ;;  %v632_v41 = vpop.f32.mrf.mxu1  ;;  %v733_v5 = vld [vmem:[%s2672_s3 + $0x88] sm:$0xf] }
 0x10b   :  { %v680_v61 = vadd.f32 %v679_v32, %v1847_v48  ;;  %v633_v47 = vadd.f32 %v632_v41, %v1853_v51  ;;  %v818_v41 = vunpack.c.h.bf16 %v736_v26 }
 0x10c   :  { %v1019_v42 = vmax.f32 %v907_v8, 0.0  ;;  %v915_v55 = vadd.f32 %v803_v31, %v584_v38  ;;  %v817_v8 = vunpack.c.l.bf16 %v736_v26  ;;  %v741_v26 = vld [vmem:[%s2672_s3 + $0xc0] sm:$0xf] }
 0x10d   :  { %v910_v44 = vadd.f32 %v798_v0, %v680_v61  ;;  %v916_v56 = vadd.f32 %v804_v46, %v633_v47  ;;  %v809_v0 = vunpack.c.h.bf16 %v2033_v15  ;;  %v812_v46 = vunpack.c.l.bf16 %v733_v5 }
 0x10e   :  { %1132 = vst [vmem:[%s2673_s4 + $0x88] sm:$0xff] %v1019_v42  ;;  %v1027_v62 = vmax.f32 %v915_v55, 0.0 }
 0x10f   :  { %v1022_v48 = vmax.f32 %v910_v44, 0.0  ;;  %v1028_v6 = vmax.f32 %v916_v56, 0.0  ;;  %v534_v9 = vpop.f32.mrf.mxu3 }
 0x110   :  { %v535_v29 = vadd.f32 %v534_v9, %v1853_v51  ;;  %1140 = vst [vmem:[%s2673_s4 + $0xc8] sm:$0xff] %v1027_v62  ;;  %v737_v62 = vld [vmem:[%s2672_s3 + $0xa4] sm:$0xf]  ;;  %v816_v9 = vunpack.c.h.bf16 %v2061_v43 }
 0x111   :  { %1135 = vst.msk [vmem:[%s2673_s4 + $0xa0] sm:$0xff] %vm1120_vm1, %v1022_v48  ;;  %v586_v12 = vpop.f32.mrf.mxu0 }
 0x112   :  { %v681_v23 = vpop.f32.mrf.mxu2  ;;  %1141 = vst [vmem:[%s2673_s4 + $0xd0] sm:$0xff] %v1028_v6  ;;  %v914_v35 = vadd.f32 %v802_v2, %v535_v29  ;;  %v587_v27 = vadd.f32 %v586_v12, %v1851_v50  ;;  %v635_v17 = vpop.f32.mrf.mxu1  ;;  %v740_v2 = vld [vmem:[%s2672_s3 + $0xb8] sm:$0xff] }
 0x113   :  { %v682_v14 = vadd.f32 %v681_v23, %v1853_v51  ;;  %v636_v18 = vadd.f32 %v635_v17, %v1851_v50  ;;  %v819_v23 = vunpack.c.l.bf16 %v737_v62  ;;  %v824_v12 = vunpack.c.l.bf16 %v740_v2  ;;  %v748_v62 = vld [vmem:[%s2672_s3 + $0xf0] sm:$0xff] }
 0x114   :  { %v1026_v19 = vmax.f32 %v914_v35, 0.0  ;;  %v922_v24 = vadd.f32 %v810_v10, %v587_v27 }
 0x115   :  { %v917_v49 = vadd.f32 %v805_v4, %v682_v14  ;;  %v923_v25 = vadd.f32 %v811_v13, %v636_v18  ;;  %v825_v14 = vunpack.c.h.bf16 %v740_v2 }
 0x116   :  { %1139 = vst [vmem:[%s2673_s4 + $0xc0] sm:$0xff] %v1026_v19  ;;  %v1034_v30 = vmax.f32 %v922_v24, 0.0 }
 0x117   :  { %v1029_v51 = vmax.f32 %v917_v49, 0.0  ;;  %v1035_v31 = vmax.f32 %v923_v25, 0.0  ;;  %v537_v32 = vpop.f32.mrf.mxu3 }
 0x118   :  { %v538_v37 = vadd.f32 %v537_v32, %v1851_v50  ;;  %1147 = vst [vmem:[%s2673_s4 + $0x100] sm:$0xff] %v1034_v30 }
 0x119   :  { %1142 = vst.msk [vmem:[%s2673_s4 + $0xd8] sm:$0xff] %vm1120_vm1, %v1029_v51  ;;  %v588_v38 = vpop.f32.mrf.mxu0  ;;  %v744_v51 = vld [vmem:[%s2672_s3 + $0xd4] sm:$0xff] }
 0x11a   :  { %v684_v61 = vpop.f32.mrf.mxu2  ;;  %1148 = vst [vmem:[%s2673_s4 + $0x108] sm:$0xff] %v1035_v31  ;;  %v921_v15 = vadd.f32 %v809_v0, %v538_v37  ;;  %v589_v42 = vadd.f32 %v588_v38, %v1865_v40  ;;  %v637_v44 = vpop.f32.mrf.mxu1  ;;  %v823_v0 = vunpack.c.h.bf16 %v2093_v20 }
 0x11b   :  { %v685_v47 = vadd.f32 %v684_v61, %v1851_v50  ;;  %v638_v55 = vadd.f32 %v637_v44, %v1865_v40 }
 0x11c   :  { %v1033_v56 = vmax.f32 %v921_v15, 0.0  ;;  %v929_v58 = vadd.f32 %v817_v8, %v589_v42  ;;  %v831_v8 = vunpack.c.l.bf16 %v744_v51 }
 0x11d   :  { %v924_v57 = vadd.f32 %v812_v46, %v685_v47  ;;  %v930_v48 = vadd.f32 %v818_v41, %v638_v55  ;;  %v826_v46 = vunpack.c.l.bf16 %v741_v26  ;;  %v832_v41 = vunpack.c.h.bf16 %v744_v51 }
 0x11e   :  { %1146 = vst [vmem:[%s2673_s4 + $0xf8] sm:$0xff] %v1033_v56  ;;  %v1041_v6 = vmax.f32 %v929_v58, 0.0  ;;  %v837_v26 = vunpack.c.h.bf16 %v2158_v45 }
 0x11f   :  { %v1036_v50 = vmax.f32 %v924_v57, 0.0  ;;  %v1042_v29 = vmax.f32 %v930_v48, 0.0  ;;  %v539_v4 = vpop.f32.mrf.mxu3  ;;  %v745_v48 = vld [vmem:[%s2672_s3 + $0xdc] sm:$0xf] }
 0x120   :  { %v540_v10 = vadd.f32 %v539_v4, %v1865_v40  ;;  %1154 = vst [vmem:[%s2673_s4 + $0x138] sm:$0xff] %v1041_v6  ;;  %v833_v4 = vunpack.c.l.bf16 %v745_v48 }
 0x121   :  { %1149 = vst.msk [vmem:[%s2673_s4 + $0x110] sm:$0xff] %vm1120_vm1, %v1036_v50  ;;  %v591_v35 = vpop.f32.mrf.mxu0  ;;  %v830_v50 = vunpack.c.h.bf16 %v2121_v60 }
 0x122   :  { %v686_v13 = vpop.f32.mrf.mxu2  ;;  %1155 = vst [vmem:[%s2673_s4 + $0x140] sm:$0xff] %v1042_v29  ;;  %v928_v43 = vadd.f32 %v816_v9, %v540_v10  ;;  %v592_v17 = vadd.f32 %v591_v35, %v1861_v52  ;;  %v640_v18 = vpop.f32.mrf.mxu1  ;;  %v838_v10 = vunpack.c.l.bf16 %v748_v62 }
 0x123   :  { %v687_v27 = vadd.f32 %v686_v13, %v1865_v40  ;;  %v641_v19 = vadd.f32 %v640_v18, %v1861_v52  ;;  %v839_v13 = vunpack.c.h.bf16 %v748_v62 }
 0x124   :  { %v1040_v49 = vmax.f32 %v928_v43, 0.0  ;;  %v936_v25 = vadd.f32 %v824_v12, %v592_v17 }
 0x125   :  { %v931_v24 = vadd.f32 %v819_v23, %v687_v27  ;;  %v937_v5 = vadd.f32 %v825_v14, %v641_v19 }
 0x126   :  { %1153 = vst [vmem:[%s2673_s4 + $0x130] sm:$0xff] %v1040_v49  ;;  %v1048_v30 = vmax.f32 %v936_v25, 0.0  ;;  %v752_v25 = vld [vmem:[%s2672_s3 + $0x10c] sm:$0xff] }
 0x127   :  { %v1043_v40 = vmax.f32 %v931_v24, 0.0  ;;  %v1049_v31 = vmax.f32 %v937_v5, 0.0  ;;  %v542_v32 = vpop.f32.mrf.mxu3  ;;  %v749_v24 = vld [vmem:[%s2672_s3 + $0xf8] sm:$0xf] }
 0x128   :  { %v543_v37 = vadd.f32 %v542_v32, %v1861_v52  ;;  %1161 = vst [vmem:[%s2673_s4 + $0x170] sm:$0xff] %v1048_v30 }
 0x129   :  { %1156 = vst.msk [vmem:[%s2673_s4 + $0x148] sm:$0xff] %vm1120_vm1, %v1043_v40  ;;  %v593_v38 = vpop.f32.mrf.mxu0 }
 0x12a   :  { %v689_v61 = vpop.f32.mrf.mxu2  ;;  %1162 = vst [vmem:[%s2673_s4 + $0x178] sm:$0xff] %v1049_v31  ;;  %v935_v20 = vadd.f32 %v823_v0, %v543_v37  ;;  %v594_v47 = vadd.f32 %v593_v38, %v1867_v53  ;;  %v642_v42 = vpop.f32.mrf.mxu1  ;;  %v840_v0 = vunpack.c.l.bf16 %v749_v24  ;;  %v845_v31 = vunpack.c.l.bf16 %v752_v25 }
 0x12b   :  { %v690_v15 = vadd.f32 %v689_v61, %v1861_v52  ;;  %v643_v44 = vadd.f32 %v642_v42, %v1867_v53 }
 0x12c   :  { %v1047_v55 = vmax.f32 %v935_v20, 0.0  ;;  %v943_v57 = vadd.f32 %v831_v8, %v594_v47 }
 0x12d   :  { %v938_v56 = vadd.f32 %v826_v46, %v690_v15  ;;  %v944_v58 = vadd.f32 %v832_v41, %v643_v44  ;;  %v846_v46 = vunpack.c.h.bf16 %v752_v25  ;;  %v753_v44 = vld [vmem:[%s2672_s3 + $0x114] sm:$0xf] }
 0x12e   :  { %1160 = vst [vmem:[%s2673_s4 + $0x168] sm:$0xff] %v1047_v55  ;;  %v1055_v2 = vmax.f32 %v943_v57, 0.0  ;;  %v756_v55 = vld [vmem:[%s2672_s3 + $0x128] sm:$0xff]  ;;  %v844_v57 = vunpack.c.h.bf16 %v2191_v11 }
 0x12f   :  { %v1050_v52 = vmax.f32 %v938_v56, 0.0  ;;  %v1056_v6 = vmax.f32 %v944_v58, 0.0  ;;  %v544_v9 = vpop.f32.mrf.mxu3 }
 0x130   :  { %v545_v29 = vadd.f32 %v544_v9, %v1867_v53  ;;  %1168 = vst [vmem:[%s2673_s4 + $0x1a8] sm:$0xff] %v1055_v2  ;;  %v852_v2 = vunpack.c.l.bf16 %v756_v55  ;;  %v853_v9 = vunpack.c.h.bf16 %v756_v55 }
 0x131   :  { %1163 = vst.msk [vmem:[%s2673_s4 + $0x180] sm:$0xff] %vm1120_vm1, %v1050_v52  ;;  %v596_v12 = vpop.f32.mrf.mxu0  ;;  %v847_v52 = vunpack.c.l.bf16 %v753_v44 }
 0x132   :  { %v691_v23 = vpop.f32.mrf.mxu2  ;;  %1169 = vst [vmem:[%s2673_s4 + $0x1b0] sm:$0xff] %v1056_v6  ;;  %v942_v60 = vadd.f32 %v830_v50, %v545_v29  ;;  %v597_v14 = vadd.f32 %v596_v12, %v1874_v59  ;;  %v645_v43 = vpop.f32.mrf.mxu1 }
 0x133   :  { %v692_v35 = vadd.f32 %v691_v23, %v1867_v53  ;;  %v646_v27 = vadd.f32 %v645_v43, %v1874_v59  ;;  %v760_v43 = vld [vmem:[%s2672_s3 + $0x144] sm:$0xff] }
 0x134   :  { %v1054_v17 = vmax.f32 %v942_v60, 0.0  ;;  %v950_v19 = vadd.f32 %v838_v10, %v597_v14  ;;  %v757_v14 = vld [vmem:[%s2672_s3 + $0x130] sm:$0xf]  ;;  %v859_v25 = vunpack.c.l.bf16 %v760_v43 }
 0x135   :  { %v945_v18 = vadd.f32 %v833_v4, %v692_v35  ;;  %v951_v49 = vadd.f32 %v839_v13, %v646_v27  ;;  %v854_v24 = vunpack.c.l.bf16 %v757_v14 }
 0x136   :  { %1167 = vst [vmem:[%s2673_s4 + $0x1a0] sm:$0xff] %v1054_v17  ;;  %v1062_v5 = vmax.f32 %v950_v19, 0.0  ;;  %v851_v17 = vunpack.c.h.bf16 %v2228_v39 }
 0x137   :  { %v1057_v53 = vmax.f32 %v945_v18, 0.0  ;;  %v1063_v51 = vmax.f32 %v951_v49, 0.0  ;;  %v547_v40 = vpop.f32.mrf.mxu3 }
 0x138   :  { %v548_v30 = vadd.f32 %v547_v40, %v1874_v59  ;;  %1175 = vst [vmem:[%s2673_s4 + $0x1e0] sm:$0xff] %v1062_v5 }
 0x139   :  { %1170 = vst.msk [vmem:[%s2673_s4 + $0x1b8] sm:$0xff] %vm1120_vm1, %v1057_v53  ;;  %v598_v37 = vpop.f32.mrf.mxu0 }
 0x13a   :  { %v694_v32 = vpop.f32.mrf.mxu2  ;;  %1176 = vst [vmem:[%s2673_s4 + $0x1e8] sm:$0xff] %v1063_v51  ;;  %v949_v45 = vadd.f32 %v837_v26, %v548_v30  ;;  %v599_v61 = vadd.f32 %v598_v37, %v1869_v54  ;;  %v647_v38 = vpop.f32.mrf.mxu1  ;;  %v860_v26 = vunpack.c.h.bf16 %v760_v43 }
 0x13b   :  { %v695_v8 = vadd.f32 %v694_v32, %v1874_v59  ;;  %v648_v41 = vadd.f32 %v647_v38, %v1869_v54  ;;  %v858_v38 = vunpack.c.h.bf16 %v2261_v36 }
 0x13c   :  { %v1061_v20 = vmax.f32 %v949_v45, 0.0  ;;  %v957_v47 = vadd.f32 %v845_v31, %v599_v61  ;;  %v761_v45 = vld [vmem:[%s2672_s3 + $0x14c] sm:$0xf] }
 0x13d   :  { %v952_v15 = vadd.f32 %v840_v0, %v695_v8  ;;  %v958_v42 = vadd.f32 %v846_v46, %v648_v41  ;;  %v764_v8 = vld [vmem:[%s2672_s3 + $0x160] sm:$0xff] }
 0x13e   :  { %1174 = vst [vmem:[%s2673_s4 + $0x1d8] sm:$0xff] %v1061_v20  ;;  %v1069_v56 = vmax.f32 %v957_v47, 0.0  ;;  %v861_v47 = vunpack.c.l.bf16 %v761_v45 }
 0x13f   :  { %v1064_v59 = vmax.f32 %v952_v15, 0.0  ;;  %v1070_v58 = vmax.f32 %v958_v42, 0.0  ;;  %v549_v48 = vpop.f32.mrf.mxu3  ;;  %v866_v42 = vunpack.c.l.bf16 %v764_v8 }
 0x140   :  { %v550_v62 = vadd.f32 %v549_v48, %v1869_v54  ;;  %1182 = vst [vmem:[%s2673_s4 + $0x218] sm:$0xff] %v1069_v56 }
 0x141   :  { %1177 = vst.msk [vmem:[%s2673_s4 + $0x1f0] sm:$0xff] %vm1120_vm1, %v1064_v59  ;;  %v601_v6 = vpop.f32.mrf.mxu0  ;;  %v867_v59 = vunpack.c.h.bf16 %v764_v8 }
 0x142   :  { %v696_v50 = vpop.f32.mrf.mxu2  ;;  %1183 = vst [vmem:[%s2673_s4 + $0x220] sm:$0xff] %v1070_v58  ;;  %v956_v11 = vadd.f32 %v844_v57, %v550_v62  ;;  %v602_v4 = vadd.f32 %v601_v6, %v1878_v63  ;;  %v650_v10 = vpop.f32.mrf.mxu1  ;;  %v765_v6 = vld [vmem:[%s2672_s3 + $0x168] sm:$0xf] }
 0x143   :  { %v697_v29 = vadd.f32 %v696_v50, %v1869_v54  ;;  %v651_v23 = vadd.f32 %v650_v10, %v1878_v63 }
 0x144   :  { %v1068_v12 = vmax.f32 %v956_v11, 0.0  ;;  %v964_v60 = vadd.f32 %v852_v2, %v602_v4 }
 0x145   :  { %v959_v13 = vadd.f32 %v847_v52, %v697_v29  ;;  %v965_v35 = vadd.f32 %v853_v9, %v651_v23  ;;  %v768_v9 = vld [vmem:[%s2672_s3 + $0x17c] sm:$0xff]  ;;  %v865_v29 = vunpack.c.h.bf16 %v2147_v21 }
 0x146   :  { %1181 = vst [vmem:[%s2673_s4 + $0x210] sm:$0xff] %v1068_v12  ;;  %v1076_v27 = vmax.f32 %v964_v60, 0.0  ;;  %v868_v12 = vunpack.c.l.bf16 %v765_v6  ;;  %v874_v14 = vunpack.c.h.bf16 %v768_v9 }
 0x147   :  { %v1071_v54 = vmax.f32 %v959_v13, 0.0  ;;  %v1077_v18 = vmax.f32 %v965_v35, 0.0  ;;  %v552_v19 = vpop.f32.mrf.mxu3  ;;  %v873_v13 = vunpack.c.l.bf16 %v768_v9 }
 0x148   :  { %v553_v49 = vadd.f32 %v552_v19, %v1878_v63  ;;  %1189 = vst [vmem:[%s2673_s4 + $0x250] sm:$0xff] %v1076_v27 }
 0x149   :  { %1184 = vst.msk [vmem:[%s2673_s4 + $0x228] sm:$0xff] %vm1120_vm1, %v1071_v54  ;;  %v603_v5 = vpop.f32.mrf.mxu0 }
 0x14a   :  { %v699_v53 = vpop.f32.mrf.mxu2  ;;  %1190 = vst [vmem:[%s2673_s4 + $0x258] sm:$0xff] %v1077_v18  ;;  %v963_v39 = vadd.f32 %v851_v17, %v553_v49  ;;  %v604_v40 = vadd.f32 %v603_v5, %v1915_v22  ;;  %v652_v30 = vpop.f32.mrf.mxu1 }
 0x14b   :  { %v700_v51 = vadd.f32 %v699_v53, %v1878_v63  ;;  %v653_v0 = vadd.f32 %v652_v30, %v1915_v22  ;;  %v772_v53 = vld [vmem:[%s2672_s3 + $0x198] sm:$0xff] }
 0x14c   :  { %v1075_v31 = vmax.f32 %v963_v39, 0.0  ;;  %v971_v37 = vadd.f32 %v859_v25, %v604_v40  ;;  %v769_v25 = vld [vmem:[%s2672_s3 + $0x184] sm:$0xf] }
 0x14d   :  { %v966_v32 = vadd.f32 %v854_v24, %v700_v51  ;;  %v972_v46 = vadd.f32 %v860_v26, %v653_v0  ;;  %v872_v26 = vunpack.c.h.bf16 %v2186_v1  ;;  %v875_v30 = vunpack.c.l.bf16 %v769_v25 }
 0x14e   :  { %1188 = vst [vmem:[%s2673_s4 + $0x248] sm:$0xff] %v1075_v31  ;;  %v1083_v61 = vmax.f32 %v971_v37, 0.0  ;;  %v880_v0 = vunpack.c.l.bf16 %v772_v53  ;;  %v881_v37 = vunpack.c.h.bf16 %v772_v53 }
 0x14f   :  { %v1078_v63 = vmax.f32 %v966_v32, 0.0  ;;  %v1084_v41 = vmax.f32 %v972_v46, 0.0  ;;  %v554_v20 = vpop.f32.mrf.mxu3 }
 0x150   :  { %v555_v15 = vadd.f32 %v554_v20, %v1915_v22  ;;  %1196 = vst [vmem:[%s2673_s4 + $0x288] sm:$0xff] %v1083_v61 }
 0x151   :  { %1191 = vst.msk [vmem:[%s2673_s4 + $0x260] sm:$0xff] %vm1120_vm1, %v1078_v63  ;;  %v606_v55 = vpop.f32.mrf.mxu0 }
 0x152   :  { %v701_v44 = vpop.f32.mrf.mxu2  ;;  %1197 = vst [vmem:[%s2673_s4 + $0x290] sm:$0xff] %v1084_v41  ;;  %v970_v36 = vadd.f32 %v858_v38, %v555_v15  ;;  %v607_v57 = vadd.f32 %v606_v55, %v1891_v3  ;;  %v655_v58 = vpop.f32.mrf.mxu1  ;;  %v773_v15 = vld [vmem:[%s2672_s3 + $0x1a0] sm:$0xf] }
 0x153   :  { %v702_v56 = vadd.f32 %v701_v44, %v1915_v22  ;;  %v656_v48 = vadd.f32 %v655_v58, %v1891_v3  ;;  %v879_v44 = vunpack.c.h.bf16 %v2217_v33 }
 0x154   :  { %v1082_v62 = vmax.f32 %v970_v36, 0.0  ;;  %v978_v2 = vadd.f32 %v866_v42, %v607_v57 }
 0x155   :  { %v973_v52 = vadd.f32 %v861_v47, %v702_v56  ;;  %v979_v50 = vadd.f32 %v867_v59, %v656_v48  ;;  %v776_v47 = vld [vmem:[%s2672_s3 + $0x1b4] sm:$0xff]  ;;  %v882_v56 = vunpack.c.l.bf16 %v773_v15 }
 0x156   :  { %1195 = vst [vmem:[%s2673_s4 + $0x280] sm:$0xff] %v1082_v62  ;;  %v1090_v11 = vmax.f32 %v978_v2, 0.0  ;;  %v887_v57 = vunpack.c.l.bf16 %v776_v47  ;;  %v888_v62 = vunpack.c.h.bf16 %v776_v47 }
 0x157   :  { %v1085_v22 = vmax.f32 %v973_v52, 0.0  ;;  %v1091_v4 = vmax.f32 %v979_v50, 0.0  ;;  %v557_v10 = vpop.f32.mrf.mxu3 }
 0x158   :  { %v558_v23 = vadd.f32 %v557_v10, %v1891_v3  ;;  %1203 = vst [vmem:[%s2673_s4 + $0x2c0] sm:$0xff] %v1090_v11 }
 0x159   :  { %1198 = vst.msk [vmem:[%s2673_s4 + $0x298] sm:$0xff] %vm1120_vm1, %v1085_v22  ;;  %v608_v35 = vpop.f32.mrf.mxu0 }
 0x15a   :  { %v704_v60 = vpop.f32.mrf.mxu2  ;;  %1204 = vst [vmem:[%s2673_s4 + $0x2c8] sm:$0xff] %v1091_v4  ;;  %v977_v21 = vadd.f32 %v865_v29, %v558_v23  ;;  %v609_v54 = vadd.f32 %v608_v35, %v1922_v28  ;;  %v657_v27 = vpop.f32.mrf.mxu1  ;;  %v777_v4 = vld [vmem:[%s2672_s3 + $0x1bc] sm:$0xf] }
 0x15b   :  { %v705_v43 = vadd.f32 %v704_v60, %v1891_v3  ;;  %v658_v17 = vadd.f32 %v657_v27, %v1922_v28  ;;  %v889_v35 = vunpack.c.l.bf16 %v777_v4 }
 0x15c   :  { %v1089_v18 = vmax.f32 %v977_v21, 0.0  ;;  %v985_v49 = vadd.f32 %v873_v13, %v609_v54 }
 0x15d   :  { %v980_v19 = vadd.f32 %v868_v12, %v705_v43  ;;  %v986_v24 = vadd.f32 %v874_v14, %v658_v17 }
 0x15e   :  { %1202 = vst [vmem:[%s2673_s4 + $0x2b8] sm:$0xff] %v1089_v18  ;;  %v1097_v5 = vmax.f32 %v985_v49, 0.0 }
 0x15f   :  { %v1092_v3 = vmax.f32 %v980_v19, 0.0  ;;  %v1098_v39 = vmax.f32 %v986_v24, 0.0  ;;  %v559_v51 = vpop.f32.mrf.mxu3 }
 0x160   :  { %v560_v40 = vadd.f32 %v559_v51, %v1922_v28  ;;  %1210 = vst [vmem:[%s2673_s4 + $0x2f8] sm:$0xff] %v1097_v5 }
 0x161   :  { %1205 = vst.msk [vmem:[%s2673_s4 + $0x2d0] sm:$0xff] %vm1120_vm1, %v1092_v3  ;;  %v611_v32 = vpop.f32.mrf.mxu0 }
 0x162   :  { %v706_v31 = vpop.f32.mrf.mxu2  ;;  %1211 = vst [vmem:[%s2673_s4 + $0x300] sm:$0xff] %v1098_v39  ;;  %v984_v1 = vadd.f32 %v872_v26, %v560_v40  ;;  %v612_v45 = vadd.f32 %v611_v32, %v1961_v7  ;;  %v660_v8 = vpop.f32.mrf.mxu1 }
 0x163   :  { %v707_v46 = vadd.f32 %v706_v31, %v1922_v28  ;;  %v661_v63 = vadd.f32 %v660_v8, %v1961_v7 }
 0x164   :  { %v1096_v61 = vmax.f32 %v984_v1, 0.0  ;;  %v992_v41 = vadd.f32 %v880_v0, %v612_v45 }
 0x165   :  { %v987_v38 = vadd.f32 %v875_v30, %v707_v46  ;;  %v993_v20 = vadd.f32 %v881_v37, %v661_v63 }
 0x166   :  { %1209 = vst [vmem:[%s2673_s4 + $0x2f0] sm:$0xff] %v1096_v61  ;;  %v1104_v42 = vmax.f32 %v992_v41, 0.0 }
 0x167   :  { %v1099_v28 = vmax.f32 %v987_v38, 0.0  ;;  %v1105_v55 = vmax.f32 %v993_v20, 0.0  ;;  %v562_v59 = vpop.f32.mrf.mxu3 }
 0x168   :  { %v563_v36 = vadd.f32 %v562_v59, %v1961_v7  ;;  %1217 = vst [vmem:[%s2673_s4 + $0x330] sm:$0xff] %v1104_v42 }
 0x169   :  { %1212 = vst.msk [vmem:[%s2673_s4 + $0x308] sm:$0xff] %vm1120_vm1, %v1099_v28  ;;  %v613_v48 = vpop.f32.mrf.mxu0 }
 0x16a   :  { %v709_v58 = vpop.f32.mrf.mxu2  ;;  %1218 = vst [vmem:[%s2673_s4 + $0x338] sm:$0xff] %v1105_v55  ;;  %v991_v33 = vadd.f32 %v879_v44, %v563_v36  ;;  %v614_v2 = vadd.f32 %v613_v48, %v1996_v34  ;;  %v662_v50 = vpop.f32.mrf.mxu1 }
 0x16b   :  { %v710_v52 = vadd.f32 %v709_v58, %v1961_v7  ;;  %v663_v6 = vadd.f32 %v662_v50, %v1996_v34  ;;  %v886_v7 = vunpack.c.h.bf16 %v2256_v16 }
 0x16c   :  { %v1103_v9 = vmax.f32 %v991_v33, 0.0  ;;  %v999_v11 = vadd.f32 %v887_v57, %v614_v2 }
 0x16d   :  { %v994_v22 = vadd.f32 %v882_v56, %v710_v52  ;;  %v1000_v29 = vadd.f32 %v888_v62, %v663_v6 }
 0x16e   :  { %1216 = vst [vmem:[%s2673_s4 + $0x328] sm:$0xff] %v1103_v9  ;;  %v1111_v23 = vmax.f32 %v999_v11, 0.0 }
 0x16f   :  { %v1106_v10 = vmax.f32 %v994_v22, 0.0  ;;  %v1112_v12 = vmax.f32 %v1000_v29, 0.0  ;;  %v564_v13 = vpop.f32.mrf.mxu3 }
 0x170   :  { %v565_v60 = vadd.f32 %v564_v13, %v1996_v34  ;;  %1224 = vst [vmem:[%s2673_s4 + $0x368] sm:$0xff] %v1111_v23 }
 0x171   :  { %1219 = vst.msk [vmem:[%s2673_s4 + $0x340] sm:$0xff] %vm1120_vm1, %v1106_v10 }
 0x172   :  { %v711_v14 = vpop.f32.mrf.mxu2  ;;  %1225 = vst [vmem:[%s2673_s4 + $0x370] sm:$0xff] %v1112_v12  ;;  %v998_v16 = vadd.f32 %v886_v7, %v565_v60 }
 0x173   :  { %v712_v21 = vadd.f32 %v711_v14, %v1996_v34 }
 0x174   :  { %v1110_v43 = vmax.f32 %v998_v16, 0.0 }
 0x175   :  { %v1001_v54 = vadd.f32 %v889_v35, %v712_v21 }
 0x176   :  { %1223 = vst [vmem:[%s2673_s4 + $0x360] sm:$0xff] %v1110_v43 }
 0x177   :  { %v1113_v27 = vmax.f32 %v1001_v54, 0.0 }
 0x179   :  { %1226 = vst.msk [vmem:[%s2673_s4 + $0x378] sm:$0xff] %vm1120_vm1, %v1113_v27 }

</bundles_post_ra>
